<compile_context>
chip_gen: v5e
topology: v5e:2x2
jax: 0.10.0
libtpu: 0.0.40
codegen_flags: <defaults>
</compile_context>

<pallas_src>
import functools

import jax
import jax.numpy as jnp
import numpy as np
from jax import lax
from jax.experimental import pallas as pl
from jax.experimental.pallas import tpu as pltpu


def fusion_kernel(x_ref, w_ref, b_ref, w1_ref, b1_ref, o_ref,
                  comb_ref, feat_ref, col_ref, *, grains, width, wp):
    # x_ref:   (1, C*G, H*W)  bf16 raw grains, PyTorch channel order c*G+g, unpadded
    # w_ref:   (Cout, 9*Cin_k) bf16 im2col tap weights (BN scale + mean branch folded)
    # b_ref:   (Cout, 1) f32 fused bias; w1_ref: (K, Cout) f32; b1_ref: (K, 1) f32
    # o_ref:   (1, K, Nout_pad) f32, Nout_pad multiple of 128 (junk cols stripped outside)
    # comb_ref:(Cin_k, H*W)   bf16 scratch: [raw rows | grain-max rows], unpadded
    # feat_ref:(Cin_k, Lslab) bf16 scratch: zero-padded, flattened (Hp*Wp) feature slab
    # col_ref: (9*Cin_k, Nout_pad) bf16 scratch: im2col slab (tap-major rows)
    _, CG, HW = x_ref.shape
    Cin_k, Lslab = feat_ref.shape
    Kdim, Nout_pad = col_ref.shape
    G, W, Wp = grains, width, wp
    C = CG // G
    H = HW // W
    assert Kdim == 9 * Cin_k and Cin_k == CG + C
    assert Lslab >= Nout_pad + 2 * Wp + 2          # tap windows never read OOB

    # ---- multi-grain fusion: raw rows + max over G (PyTorch order, no transpose) ----
    raw = x_ref[0]                                  # (CG, HW), single load
    comb_ref[0:CG, :] = raw                         # raw view channels c*G+g
    for c in range(C):
        base = c * G
        m = raw[base:base + 1, :]                   # (1, HW)
        for g in range(1, G):
            m = jnp.maximum(m, raw[base + g:base + g + 1, :])
        comb_ref[CG + c:CG + c + 1, :] = m          # torch.max(...).values branch
    # (mean-over-G branch is linear -> folded into the raw tap weights in the wrapper)

    # ---- in-kernel "SAME" zero padding: scatter row strips into the padded slab ----
    feat_ref[...] = jnp.zeros_like(feat_ref)        # zero border + junk tail once
    for h in range(H):
        dst = (h + 1) * Wp + 1
        feat_ref[:, dst:dst + W] = comb_ref[:, h * W:(h + 1) * W]

    # ---- im2col: 9 shifted views of the slab stacked on sublanes (tap = dh*3+dw) ----
    for dh in range(3):
        for dw in range(3):
            t = dh * 3 + dw
            off = dh * Wp + dw                      # flat tap offset in the padded slab
            col_ref[t * Cin_k:(t + 1) * Cin_k, :] = feat_ref[:, off:off + Nout_pad]

    # ---- single deep bf16 matmul (contraction K = 9*Cin_k), f32 accumulate ----
    acc = jnp.dot(w_ref[...], col_ref[...],
                  preferred_element_type=jnp.float32)            # (Cout, Nout_pad) f32

    # ---- fused bias (conv bias + BN shift) + ReLU + 1x1 conv, all f32, lane-dense ----
    y = jnp.maximum(acc + b_ref[...], 0.0)                        # (Cout, Nout_pad)
    out = jnp.dot(w1_ref[...], y, preferred_element_type=jnp.float32) + b1_ref[...]
    o_ref[0] = out.astype(o_ref.dtype)                            # (K, Nout_pad)


def fusion_forward(x, params):
    """x: (N, C, G, H, W) float32 -> (N, K, H, W) float32 (PyTorch layout)."""
    (w3, b3, gamma, beta, rmean, rvar, eps, w1, b1) = params
    N, C, G, H, W = x.shape
    Cout = w3.shape[0]
    K = w1.shape[0]
    assert w3.shape[1] == C * (G + 2)

    CG = C * G
    Cin_k = CG + C                                  # raw + max rows (mean folded away)
    Kdim = 9 * Cin_k
    HW = H * W
    Hp, Wp = H + 2, W + 2
    Nout = H * Wp                                   # valid rows x padded width
    Nout_pad = ((Nout + 127) // 128) * 128          # lane-dense multiple of 128
    max_off = 2 * Wp + 2                            # largest tap offset (dh=dw=2)
    Lslab = ((max(Hp * Wp, Nout_pad + max_off) + 127) // 128) * 128
    assert Lslab >= Nout_pad + max_off and Lslab >= Hp * Wp

    # ---- activation: free reshape to the PyTorch raw view + bf16 cast only ---------
    x_flat = x.reshape(N, CG, HW).astype(jnp.bfloat16)

    # ---- fold BatchNorm (inference) scale + mean branch into one bf16 tap matrix ----
    scale = gamma / jnp.sqrt(rvar + eps)                          # (Cout,)
    w3_s = w3 * scale[:, None, None, None]                        # (Cout, Cin, 3, 3)
    b_eff = (b3 * scale + beta - rmean * scale).reshape(Cout, 1).astype(jnp.float32)

    # raw channels keep PyTorch order c*G+g; mean over G is linear -> exact fold
    w_raw = (w3_s[:, :CG].reshape(Cout, C, G, 3, 3)
             + (w3_s[:, CG + C:] / G)[:, :, None]).reshape(Cout, CG, 3, 3)
    w_max = w3_s[:, CG:CG + C]                                    # (Cout, C, 3, 3)
    w_all = jnp.concatenate([w_raw, w_max], axis=1)               # (Cout, Cin_k, 3, 3)
    # im2col column order: (dh*3+dw)*Cin_k + feature_row
    w_cat = (jnp.transpose(w_all, (0, 2, 3, 1))
             .reshape(Cout, Kdim).astype(jnp.bfloat16))

    w1_k = w1[:, :, 0, 0].astype(jnp.float32)                     # (K, Cout)
    b1_k = b1.reshape(K, 1).astype(jnp.float32)

    kernel = functools.partial(fusion_kernel, grains=G, width=W, wp=Wp)

    out_flat = pl.pallas_call(
        kernel,
        out_shape=jax.ShapeDtypeStruct((N, K, Nout_pad), jnp.float32),
        grid=(N,),
        in_specs=[
            pl.BlockSpec((1, CG, HW), lambda n: (n, 0, 0)),
            pl.BlockSpec((Cout, Kdim), lambda n: (0, 0)),
            pl.BlockSpec((Cout, 1), lambda n: (0, 0)),
            pl.BlockSpec((K, Cout), lambda n: (0, 0)),
            pl.BlockSpec((K, 1), lambda n: (0, 0)),
        ],
        out_specs=pl.BlockSpec((1, K, Nout_pad), lambda n: (n, 0, 0)),
        scratch_shapes=[
            pltpu.VMEM((Cin_k, HW), jnp.bfloat16),      # unpadded raw+max rows
            pltpu.VMEM((Cin_k, Lslab), jnp.bfloat16),   # padded, flattened feature slab
            pltpu.VMEM((Kdim, Nout_pad), jnp.bfloat16), # im2col slab
        ],
        compiler_params=pltpu.CompilerParams(
            dimension_semantics=("parallel",)),
    )(x_flat, w_cat, b_eff, w1_k, b1_k)

    # (N, K, Nout_pad) -> keep valid flat positions -> strip 2 pad cols per row -> NCHW
    return out_flat[:, :, :Nout].reshape(N, K, H, Wp)[:, :, :, :W]


def fusion_reference(x, params):
    """Pure-JAX reference mirroring the PyTorch forward exactly (f32)."""
    (w3, b3, gamma, beta, rmean, rvar, eps, w1, b1) = params
    N, C, G, H, W = x.shape
    x_mean = jnp.mean(x, axis=2)                         # (N,C,H,W)
    x_max = jnp.max(x, axis=2)                           # torch.max(...).values
    x_view = x.reshape(N, C * G, H, W)                   # channel = c*G + g
    feat = jnp.concatenate([x_view, x_max, x_mean], axis=1)
    feat = jnp.transpose(feat, (0, 2, 3, 1))             # NHWC
    w3_hwio = jnp.transpose(w3, (2, 3, 1, 0))
    y = lax.conv_general_dilated(feat, w3_hwio, (1, 1), "SAME",
                                 dimension_numbers=("NHWC", "HWIO", "NHWC"),
                                 precision=lax.Precision.HIGHEST)
    y = y + b3
    y = (y - rmean) / jnp.sqrt(rvar + eps) * gamma + beta
    y = jnp.maximum(y, 0.0)
    out = jnp.einsum("nhwc,kc->nhwk", y, w1[:, :, 0, 0],
                     precision=lax.Precision.HIGHEST) + b1
    return jnp.transpose(out, (0, 3, 1, 2))


if __name__ == "__main__":
    N, C, G, H, W = 2, 4, 3, 16, 16        # multi_grains G = 3
    out_ch, K = 8, 4
    in_ch = C * (G + 2)                    # channels after concat = 20

    key = jax.random.PRNGKey(0)
    keys = jax.random.split(key, 9)
    x = jax.random.normal(keys[0], (N, C, G, H, W), jnp.float32)

    # deterministic synthetic parameters (PyTorch shapes)
    w3 = 0.1 * jax.random.normal(keys[1], (out_ch, in_ch, 3, 3), jnp.float32)
    b3 = 0.1 * jax.random.normal(keys[2], (out_ch,), jnp.float32)
    gamma = 0.5 + jax.random.uniform(keys[3], (out_ch,), jnp.float32)
    beta = 0.1 * jax.random.normal(keys[4], (out_ch,), jnp.float32)
    rmean = 0.1 * jax.random.normal(keys[5], (out_ch,), jnp.float32)
    rvar = 0.5 + jax.random.uniform(keys[6], (out_ch,), jnp.float32)
    eps = 1e-5
    w1 = 0.1 * jax.random.normal(keys[7], (K, out_ch, 1, 1), jnp.float32)
    b1 = 0.1 * jax.random.normal(keys[8], (K,), jnp.float32)

    params = (w3, b3, gamma, beta, rmean, rvar, eps, w1, b1)

    out = jax.block_until_ready(fusion_forward(x, params))
    ref = jax.block_until_ready(fusion_reference(x, params))

    assert out.shape == (N, K, H, W), out.shape
    # bf16 matmul operands with f32 accumulation: tolerance widened from 1e-2.
    np.testing.assert_allclose(np.asarray(out), np.asarray(ref),
                               rtol=2e-2, atol=2e-2)
    print("KERNEL_OK")
</pallas_src>

<mosaic_0001>
module attributes {stable_mosaic.version = 11 : i64} {
  func.func @fusion_kernel(%arg0: i32, %arg1: memref<1x12x256xbf16, #tpu.memory_space<vmem>>, %arg2: memref<8x144xbf16, #tpu.memory_space<vmem>>, %arg3: memref<8x1xf32, #tpu.memory_space<vmem>>, %arg4: memref<4x8xf32, #tpu.memory_space<vmem>>, %arg5: memref<4x1xf32, #tpu.memory_space<vmem>>, %arg6: memref<1x4x384xf32, #tpu.memory_space<vmem>>, %arg7: memref<16x256xbf16, #tpu.memory_space<vmem>>, %arg8: memref<16x512xbf16, #tpu.memory_space<vmem>>, %arg9: memref<144x384xbf16, #tpu.memory_space<vmem>>) attributes {dimension_semantics = [#tpu.dimension_semantics<parallel>], iteration_bounds = array<i64: 2>, scalar_prefetch = 0 : i64, scratch_operands = 3 : i64, tpu.core_type = #tpu.core_type<tc>, window_params = [{transform_indices = @transform_0, window_bounds = array<i64: 1, 12, 256>}, {pipeline_mode = #tpu.pipeline_mode<synchronous>, transform_indices = @transform_1, window_bounds = array<i64: 8, 144>}, {pipeline_mode = #tpu.pipeline_mode<synchronous>, transform_indices = @transform_2, window_bounds = array<i64: 8, 1>}, {pipeline_mode = #tpu.pipeline_mode<synchronous>, transform_indices = @transform_3, window_bounds = array<i64: 4, 8>}, {pipeline_mode = #tpu.pipeline_mode<synchronous>, transform_indices = @transform_4, window_bounds = array<i64: 4, 1>}, {transform_indices = @transform_5, window_bounds = array<i64: 1, 4, 384>}]} {
    %c0 = arith.constant 0 : index
    %c0_0 = arith.constant 0 : index
    %c0_1 = arith.constant 0 : index
    %0 = vector.load %arg1[%c0, %c0_0, %c0_1] : memref<1x12x256xbf16, #tpu.memory_space<vmem>>, vector<1x12x256xbf16>
    %1 = vector.shape_cast %0 : vector<1x12x256xbf16> to vector<12x256xbf16>
    %c0_2 = arith.constant 0 : index
    %c0_3 = arith.constant 0 : index
    %2 = vector.load %arg7[%c0_2, %c0_3] : memref<16x256xbf16, #tpu.memory_space<vmem>>, vector<12x256xbf16>
    tpu.vector_store %arg7[%c0_2, %c0_3], %1 {strides = array<i32>} : memref<16x256xbf16, #tpu.memory_space<vmem>>, vector<12x256xbf16>,
    %3 = vector.extract_strided_slice %1 {offsets = [0, 0], sizes = [1, 256], strides = [1, 1]} : vector<12x256xbf16> to vector<1x256xbf16>
    %4 = vector.extract_strided_slice %1 {offsets = [1, 0], sizes = [1, 256], strides = [1, 1]} : vector<12x256xbf16> to vector<1x256xbf16>
    %5 = arith.maximumf %3, %4 : vector<1x256xbf16>
    %6 = vector.extract_strided_slice %1 {offsets = [2, 0], sizes = [1, 256], strides = [1, 1]} : vector<12x256xbf16> to vector<1x256xbf16>
    %7 = arith.maximumf %5, %6 : vector<1x256xbf16>
    %c12 = arith.constant 12 : index
    %c0_4 = arith.constant 0 : index
    %8 = vector.load %arg7[%c12, %c0_4] : memref<16x256xbf16, #tpu.memory_space<vmem>>, vector<1x256xbf16>
    tpu.vector_store %arg7[%c12, %c0_4], %7 {strides = array<i32>} : memref<16x256xbf16, #tpu.memory_space<vmem>>, vector<1x256xbf16>,
    %9 = vector.extract_strided_slice %1 {offsets = [3, 0], sizes = [1, 256], strides = [1, 1]} : vector<12x256xbf16> to vector<1x256xbf16>
    %10 = vector.extract_strided_slice %1 {offsets = [4, 0], sizes = [1, 256], strides = [1, 1]} : vector<12x256xbf16> to vector<1x256xbf16>
    %11 = arith.maximumf %9, %10 : vector<1x256xbf16>
    %12 = vector.extract_strided_slice %1 {offsets = [5, 0], sizes = [1, 256], strides = [1, 1]} : vector<12x256xbf16> to vector<1x256xbf16>
    %13 = arith.maximumf %11, %12 : vector<1x256xbf16>
    %c13 = arith.constant 13 : index
    %c0_5 = arith.constant 0 : index
    %14 = vector.load %arg7[%c13, %c0_5] : memref<16x256xbf16, #tpu.memory_space<vmem>>, vector<1x256xbf16>
    tpu.vector_store %arg7[%c13, %c0_5], %13 {strides = array<i32>} : memref<16x256xbf16, #tpu.memory_space<vmem>>, vector<1x256xbf16>,
    %15 = vector.extract_strided_slice %1 {offsets = [6, 0], sizes = [1, 256], strides = [1, 1]} : vector<12x256xbf16> to vector<1x256xbf16>
    %16 = vector.extract_strided_slice %1 {offsets = [7, 0], sizes = [1, 256], strides = [1, 1]} : vector<12x256xbf16> to vector<1x256xbf16>
    %17 = arith.maximumf %15, %16 : vector<1x256xbf16>
    %18 = vector.extract_strided_slice %1 {offsets = [8, 0], sizes = [1, 256], strides = [1, 1]} : vector<12x256xbf16> to vector<1x256xbf16>
    %19 = arith.maximumf %17, %18 : vector<1x256xbf16>
    %c14 = arith.constant 14 : index
    %c0_6 = arith.constant 0 : index
    %20 = vector.load %arg7[%c14, %c0_6] : memref<16x256xbf16, #tpu.memory_space<vmem>>, vector<1x256xbf16>
    tpu.vector_store %arg7[%c14, %c0_6], %19 {strides = array<i32>} : memref<16x256xbf16, #tpu.memory_space<vmem>>, vector<1x256xbf16>,
    %21 = vector.extract_strided_slice %1 {offsets = [9, 0], sizes = [1, 256], strides = [1, 1]} : vector<12x256xbf16> to vector<1x256xbf16>
    %22 = vector.extract_strided_slice %1 {offsets = [10, 0], sizes = [1, 256], strides = [1, 1]} : vector<12x256xbf16> to vector<1x256xbf16>
    %23 = arith.maximumf %21, %22 : vector<1x256xbf16>
    %24 = vector.extract_strided_slice %1 {offsets = [11, 0], sizes = [1, 256], strides = [1, 1]} : vector<12x256xbf16> to vector<1x256xbf16>
    %25 = arith.maximumf %23, %24 : vector<1x256xbf16>
    %c15 = arith.constant 15 : index
    %c0_7 = arith.constant 0 : index
    %26 = vector.load %arg7[%c15, %c0_7] : memref<16x256xbf16, #tpu.memory_space<vmem>>, vector<1x256xbf16>
    tpu.vector_store %arg7[%c15, %c0_7], %25 {strides = array<i32>} : memref<16x256xbf16, #tpu.memory_space<vmem>>, vector<1x256xbf16>,
    %cst = arith.constant 0.000000e+00 : bf16
    %27 = vector.broadcast %cst : bf16 to vector<16x512xbf16>
    %c0_8 = arith.constant 0 : index
    %c0_9 = arith.constant 0 : index
    %28 = vector.load %arg8[%c0_8, %c0_9] : memref<16x512xbf16, #tpu.memory_space<vmem>>, vector<16x512xbf16>
    tpu.vector_store %arg8[%c0_8, %c0_9], %27 {strides = array<i32>} : memref<16x512xbf16, #tpu.memory_space<vmem>>, vector<16x512xbf16>,
    %c0_10 = arith.constant 0 : index
    %c0_11 = arith.constant 0 : index
    %29 = vector.load %arg7[%c0_10, %c0_11] : memref<16x256xbf16, #tpu.memory_space<vmem>>, vector<16x16xbf16>
    %c0_12 = arith.constant 0 : index
    %c19 = arith.constant 19 : index
    %30 = vector.load %arg8[%c0_12, %c19] : memref<16x512xbf16, #tpu.memory_space<vmem>>, vector<16x16xbf16>
    tpu.vector_store %arg8[%c0_12, %c19], %29 {strides = array<i32>} : memref<16x512xbf16, #tpu.memory_space<vmem>>, vector<16x16xbf16>,
    %c0_13 = arith.constant 0 : index
    %c16 = arith.constant 16 : index
    %31 = vector.load %arg7[%c0_13, %c16] : memref<16x256xbf16, #tpu.memory_space<vmem>>, vector<16x16xbf16>
    %c0_14 = arith.constant 0 : index
    %c37 = arith.constant 37 : index
    %32 = vector.load %arg8[%c0_14, %c37] : memref<16x512xbf16, #tpu.memory_space<vmem>>, vector<16x16xbf16>
    tpu.vector_store %arg8[%c0_14, %c37], %31 {strides = array<i32>} : memref<16x512xbf16, #tpu.memory_space<vmem>>, vector<16x16xbf16>,
    %c0_15 = arith.constant 0 : index
    %c32 = arith.constant 32 : index
    %33 = vector.load %arg7[%c0_15, %c32] : memref<16x256xbf16, #tpu.memory_space<vmem>>, vector<16x16xbf16>
    %c0_16 = arith.constant 0 : index
    %c55 = arith.constant 55 : index
    %34 = vector.load %arg8[%c0_16, %c55] : memref<16x512xbf16, #tpu.memory_space<vmem>>, vector<16x16xbf16>
    tpu.vector_store %arg8[%c0_16, %c55], %33 {strides = array<i32>} : memref<16x512xbf16, #tpu.memory_space<vmem>>, vector<16x16xbf16>,
    %c0_17 = arith.constant 0 : index
    %c48 = arith.constant 48 : index
    %35 = vector.load %arg7[%c0_17, %c48] : memref<16x256xbf16, #tpu.memory_space<vmem>>, vector<16x16xbf16>
    %c0_18 = arith.constant 0 : index
    %c73 = arith.constant 73 : index
    %36 = vector.load %arg8[%c0_18, %c73] : memref<16x512xbf16, #tpu.memory_space<vmem>>, vector<16x16xbf16>
    tpu.vector_store %arg8[%c0_18, %c73], %35 {strides = array<i32>} : memref<16x512xbf16, #tpu.memory_space<vmem>>, vector<16x16xbf16>,
    %c0_19 = arith.constant 0 : index
    %c64 = arith.constant 64 : index
    %37 = vector.load %arg7[%c0_19, %c64] : memref<16x256xbf16, #tpu.memory_space<vmem>>, vector<16x16xbf16>
    %c0_20 = arith.constant 0 : index
    %c91 = arith.constant 91 : index
    %38 = vector.load %arg8[%c0_20, %c91] : memref<16x512xbf16, #tpu.memory_space<vmem>>, vector<16x16xbf16>
    tpu.vector_store %arg8[%c0_20, %c91], %37 {strides = array<i32>} : memref<16x512xbf16, #tpu.memory_space<vmem>>, vector<16x16xbf16>,
    %c0_21 = arith.constant 0 : index
    %c80 = arith.constant 80 : index
    %39 = vector.load %arg7[%c0_21, %c80] : memref<16x256xbf16, #tpu.memory_space<vmem>>, vector<16x16xbf16>
    %c0_22 = arith.constant 0 : index
    %c109 = arith.constant 109 : index
    %40 = vector.load %arg8[%c0_22, %c109] : memref<16x512xbf16, #tpu.memory_space<vmem>>, vector<16x16xbf16>
    tpu.vector_store %arg8[%c0_22, %c109], %39 {strides = array<i32>} : memref<16x512xbf16, #tpu.memory_space<vmem>>, vector<16x16xbf16>,
    %c0_23 = arith.constant 0 : index
    %c96 = arith.constant 96 : index
    %41 = vector.load %arg7[%c0_23, %c96] : memref<16x256xbf16, #tpu.memory_space<vmem>>, vector<16x16xbf16>
    %c0_24 = arith.constant 0 : index
    %c127 = arith.constant 127 : index
    %42 = vector.load %arg8[%c0_24, %c127] : memref<16x512xbf16, #tpu.memory_space<vmem>>, vector<16x16xbf16>
    tpu.vector_store %arg8[%c0_24, %c127], %41 {strides = array<i32>} : memref<16x512xbf16, #tpu.memory_space<vmem>>, vector<16x16xbf16>,
    %c0_25 = arith.constant 0 : index
    %c112 = arith.constant 112 : index
    %43 = vector.load %arg7[%c0_25, %c112] : memref<16x256xbf16, #tpu.memory_space<vmem>>, vector<16x16xbf16>
    %c0_26 = arith.constant 0 : index
    %c145 = arith.constant 145 : index
    %44 = vector.load %arg8[%c0_26, %c145] : memref<16x512xbf16, #tpu.memory_space<vmem>>, vector<16x16xbf16>
    tpu.vector_store %arg8[%c0_26, %c145], %43 {strides = array<i32>} : memref<16x512xbf16, #tpu.memory_space<vmem>>, vector<16x16xbf16>,
    %c0_27 = arith.constant 0 : index
    %c128 = arith.constant 128 : index
    %45 = vector.load %arg7[%c0_27, %c128] : memref<16x256xbf16, #tpu.memory_space<vmem>>, vector<16x16xbf16>
    %c0_28 = arith.constant 0 : index
    %c163 = arith.constant 163 : index
    %46 = vector.load %arg8[%c0_28, %c163] : memref<16x512xbf16, #tpu.memory_space<vmem>>, vector<16x16xbf16>
    tpu.vector_store %arg8[%c0_28, %c163], %45 {strides = array<i32>} : memref<16x512xbf16, #tpu.memory_space<vmem>>, vector<16x16xbf16>,
    %c0_29 = arith.constant 0 : index
    %c144 = arith.constant 144 : index
    %47 = vector.load %arg7[%c0_29, %c144] : memref<16x256xbf16, #tpu.memory_space<vmem>>, vector<16x16xbf16>
    %c0_30 = arith.constant 0 : index
    %c181 = arith.constant 181 : index
    %48 = vector.load %arg8[%c0_30, %c181] : memref<16x512xbf16, #tpu.memory_space<vmem>>, vector<16x16xbf16>
    tpu.vector_store %arg8[%c0_30, %c181], %47 {strides = array<i32>} : memref<16x512xbf16, #tpu.memory_space<vmem>>, vector<16x16xbf16>,
    %c0_31 = arith.constant 0 : index
    %c160 = arith.constant 160 : index
    %49 = vector.load %arg7[%c0_31, %c160] : memref<16x256xbf16, #tpu.memory_space<vmem>>, vector<16x16xbf16>
    %c0_32 = arith.constant 0 : index
    %c199 = arith.constant 199 : index
    %50 = vector.load %arg8[%c0_32, %c199] : memref<16x512xbf16, #tpu.memory_space<vmem>>, vector<16x16xbf16>
    tpu.vector_store %arg8[%c0_32, %c199], %49 {strides = array<i32>} : memref<16x512xbf16, #tpu.memory_space<vmem>>, vector<16x16xbf16>,
    %c0_33 = arith.constant 0 : index
    %c176 = arith.constant 176 : index
    %51 = vector.load %arg7[%c0_33, %c176] : memref<16x256xbf16, #tpu.memory_space<vmem>>, vector<16x16xbf16>
    %c0_34 = arith.constant 0 : index
    %c217 = arith.constant 217 : index
    %52 = vector.load %arg8[%c0_34, %c217] : memref<16x512xbf16, #tpu.memory_space<vmem>>, vector<16x16xbf16>
    tpu.vector_store %arg8[%c0_34, %c217], %51 {strides = array<i32>} : memref<16x512xbf16, #tpu.memory_space<vmem>>, vector<16x16xbf16>,
    %c0_35 = arith.constant 0 : index
    %c192 = arith.constant 192 : index
    %53 = vector.load %arg7[%c0_35, %c192] : memref<16x256xbf16, #tpu.memory_space<vmem>>, vector<16x16xbf16>
    %c0_36 = arith.constant 0 : index
    %c235 = arith.constant 235 : index
    %54 = vector.load %arg8[%c0_36, %c235] : memref<16x512xbf16, #tpu.memory_space<vmem>>, vector<16x16xbf16>
    tpu.vector_store %arg8[%c0_36, %c235], %53 {strides = array<i32>} : memref<16x512xbf16, #tpu.memory_space<vmem>>, vector<16x16xbf16>,
    %c0_37 = arith.constant 0 : index
    %c208 = arith.constant 208 : index
    %55 = vector.load %arg7[%c0_37, %c208] : memref<16x256xbf16, #tpu.memory_space<vmem>>, vector<16x16xbf16>
    %c0_38 = arith.constant 0 : index
    %c253 = arith.constant 253 : index
    %56 = vector.load %arg8[%c0_38, %c253] : memref<16x512xbf16, #tpu.memory_space<vmem>>, vector<16x16xbf16>
    tpu.vector_store %arg8[%c0_38, %c253], %55 {strides = array<i32>} : memref<16x512xbf16, #tpu.memory_space<vmem>>, vector<16x16xbf16>,
    %c0_39 = arith.constant 0 : index
    %c224 = arith.constant 224 : index
    %57 = vector.load %arg7[%c0_39, %c224] : memref<16x256xbf16, #tpu.memory_space<vmem>>, vector<16x16xbf16>
    %c0_40 = arith.constant 0 : index
    %c271 = arith.constant 271 : index
    %58 = vector.load %arg8[%c0_40, %c271] : memref<16x512xbf16, #tpu.memory_space<vmem>>, vector<16x16xbf16>
    tpu.vector_store %arg8[%c0_40, %c271], %57 {strides = array<i32>} : memref<16x512xbf16, #tpu.memory_space<vmem>>, vector<16x16xbf16>,
    %c0_41 = arith.constant 0 : index
    %c240 = arith.constant 240 : index
    %59 = vector.load %arg7[%c0_41, %c240] : memref<16x256xbf16, #tpu.memory_space<vmem>>, vector<16x16xbf16>
    %c0_42 = arith.constant 0 : index
    %c289 = arith.constant 289 : index
    %60 = vector.load %arg8[%c0_42, %c289] : memref<16x512xbf16, #tpu.memory_space<vmem>>, vector<16x16xbf16>
    tpu.vector_store %arg8[%c0_42, %c289], %59 {strides = array<i32>} : memref<16x512xbf16, #tpu.memory_space<vmem>>, vector<16x16xbf16>,
    %c0_43 = arith.constant 0 : index
    %c0_44 = arith.constant 0 : index
    %61 = vector.load %arg8[%c0_43, %c0_44] : memref<16x512xbf16, #tpu.memory_space<vmem>>, vector<16x384xbf16>
    %c0_45 = arith.constant 0 : index
    %c0_46 = arith.constant 0 : index
    %62 = vector.load %arg9[%c0_45, %c0_46] : memref<144x384xbf16, #tpu.memory_space<vmem>>, vector<16x384xbf16>
    tpu.vector_store %arg9[%c0_45, %c0_46], %61 {strides = array<i32>} : memref<144x384xbf16, #tpu.memory_space<vmem>>, vector<16x384xbf16>,
    %c0_47 = arith.constant 0 : index
    %c1 = arith.constant 1 : index
    %63 = vector.load %arg8[%c0_47, %c1] : memref<16x512xbf16, #tpu.memory_space<vmem>>, vector<16x384xbf16>
    %c16_48 = arith.constant 16 : index
    %c0_49 = arith.constant 0 : index
    %64 = vector.load %arg9[%c16_48, %c0_49] : memref<144x384xbf16, #tpu.memory_space<vmem>>, vector<16x384xbf16>
    tpu.vector_store %arg9[%c16_48, %c0_49], %63 {strides = array<i32>} : memref<144x384xbf16, #tpu.memory_space<vmem>>, vector<16x384xbf16>,
    %c0_50 = arith.constant 0 : index
    %c2 = arith.constant 2 : index
    %65 = vector.load %arg8[%c0_50, %c2] : memref<16x512xbf16, #tpu.memory_space<vmem>>, vector<16x384xbf16>
    %c32_51 = arith.constant 32 : index
    %c0_52 = arith.constant 0 : index
    %66 = vector.load %arg9[%c32_51, %c0_52] : memref<144x384xbf16, #tpu.memory_space<vmem>>, vector<16x384xbf16>
    tpu.vector_store %arg9[%c32_51, %c0_52], %65 {strides = array<i32>} : memref<144x384xbf16, #tpu.memory_space<vmem>>, vector<16x384xbf16>,
    %c0_53 = arith.constant 0 : index
    %c18 = arith.constant 18 : index
    %67 = vector.load %arg8[%c0_53, %c18] : memref<16x512xbf16, #tpu.memory_space<vmem>>, vector<16x384xbf16>
    %c48_54 = arith.constant 48 : index
    %c0_55 = arith.constant 0 : index
    %68 = vector.load %arg9[%c48_54, %c0_55] : memref<144x384xbf16, #tpu.memory_space<vmem>>, vector<16x384xbf16>
    tpu.vector_store %arg9[%c48_54, %c0_55], %67 {strides = array<i32>} : memref<144x384xbf16, #tpu.memory_space<vmem>>, vector<16x384xbf16>,
    %c0_56 = arith.constant 0 : index
    %c19_57 = arith.constant 19 : index
    %69 = vector.load %arg8[%c0_56, %c19_57] : memref<16x512xbf16, #tpu.memory_space<vmem>>, vector<16x384xbf16>
    %c64_58 = arith.constant 64 : index
    %c0_59 = arith.constant 0 : index
    %70 = vector.load %arg9[%c64_58, %c0_59] : memref<144x384xbf16, #tpu.memory_space<vmem>>, vector<16x384xbf16>
    tpu.vector_store %arg9[%c64_58, %c0_59], %69 {strides = array<i32>} : memref<144x384xbf16, #tpu.memory_space<vmem>>, vector<16x384xbf16>,
    %c0_60 = arith.constant 0 : index
    %c20 = arith.constant 20 : index
    %71 = vector.load %arg8[%c0_60, %c20] : memref<16x512xbf16, #tpu.memory_space<vmem>>, vector<16x384xbf16>
    %c80_61 = arith.constant 80 : index
    %c0_62 = arith.constant 0 : index
    %72 = vector.load %arg9[%c80_61, %c0_62] : memref<144x384xbf16, #tpu.memory_space<vmem>>, vector<16x384xbf16>
    tpu.vector_store %arg9[%c80_61, %c0_62], %71 {strides = array<i32>} : memref<144x384xbf16, #tpu.memory_space<vmem>>, vector<16x384xbf16>,
    %c0_63 = arith.constant 0 : index
    %c36 = arith.constant 36 : index
    %73 = vector.load %arg8[%c0_63, %c36] : memref<16x512xbf16, #tpu.memory_space<vmem>>, vector<16x384xbf16>
    %c96_64 = arith.constant 96 : index
    %c0_65 = arith.constant 0 : index
    %74 = vector.load %arg9[%c96_64, %c0_65] : memref<144x384xbf16, #tpu.memory_space<vmem>>, vector<16x384xbf16>
    tpu.vector_store %arg9[%c96_64, %c0_65], %73 {strides = array<i32>} : memref<144x384xbf16, #tpu.memory_space<vmem>>, vector<16x384xbf16>,
    %c0_66 = arith.constant 0 : index
    %c37_67 = arith.constant 37 : index
    %75 = vector.load %arg8[%c0_66, %c37_67] : memref<16x512xbf16, #tpu.memory_space<vmem>>, vector<16x384xbf16>
    %c112_68 = arith.constant 112 : index
    %c0_69 = arith.constant 0 : index
    %76 = vector.load %arg9[%c112_68, %c0_69] : memref<144x384xbf16, #tpu.memory_space<vmem>>, vector<16x384xbf16>
    tpu.vector_store %arg9[%c112_68, %c0_69], %75 {strides = array<i32>} : memref<144x384xbf16, #tpu.memory_space<vmem>>, vector<16x384xbf16>,
    %c0_70 = arith.constant 0 : index
    %c38 = arith.constant 38 : index
    %77 = vector.load %arg8[%c0_70, %c38] : memref<16x512xbf16, #tpu.memory_space<vmem>>, vector<16x384xbf16>
    %c128_71 = arith.constant 128 : index
    %c0_72 = arith.constant 0 : index
    %78 = vector.load %arg9[%c128_71, %c0_72] : memref<144x384xbf16, #tpu.memory_space<vmem>>, vector<16x384xbf16>
    tpu.vector_store %arg9[%c128_71, %c0_72], %77 {strides = array<i32>} : memref<144x384xbf16, #tpu.memory_space<vmem>>, vector<16x384xbf16>,
    %c0_73 = arith.constant 0 : index
    %c0_74 = arith.constant 0 : index
    %79 = vector.load %arg2[%c0_73, %c0_74] : memref<8x144xbf16, #tpu.memory_space<vmem>>, vector<8x144xbf16>
    %c0_75 = arith.constant 0 : index
    %c0_76 = arith.constant 0 : index
    %80 = vector.load %arg9[%c0_75, %c0_76] : memref<144x384xbf16, #tpu.memory_space<vmem>>, vector<144x384xbf16>
    %cst_77 = arith.constant dense<0.000000e+00> : vector<8x384xf32>
    %81 = tpu.matmul %79, %80, %cst_77 {dimension_numbers = #tpu.dot_dimension_numbers<[1], [0], [0], [1], [0, 0, 1, 1], [], []>} : vector<8x144xbf16>, vector<144x384xbf16>, vector<8x384xf32> -> vector<8x384xf32>
    %c0_78 = arith.constant 0 : index
    %c0_79 = arith.constant 0 : index
    %82 = vector.load %arg3[%c0_78, %c0_79] : memref<8x1xf32, #tpu.memory_space<vmem>>, vector<8x1xf32>
    %83 = vector.broadcast %82 : vector<8x1xf32> to vector<8x384xf32>
    %84 = arith.addf %81, %83 : vector<8x384xf32>
    %cst_80 = arith.constant 0.000000e+00 : f32
    %85 = vector.broadcast %cst_80 : f32 to vector<8x384xf32>
    %86 = arith.maximumf %84, %85 : vector<8x384xf32>
    %c0_81 = arith.constant 0 : index
    %c0_82 = arith.constant 0 : index
    %87 = vector.load %arg4[%c0_81, %c0_82] : memref<4x8xf32, #tpu.memory_space<vmem>>, vector<4x8xf32>
    %cst_83 = arith.constant dense<0.000000e+00> : vector<4x384xf32>
    %88 = tpu.matmul %87, %86, %cst_83 {dimension_numbers = #tpu.dot_dimension_numbers<[1], [0], [0], [1], [0, 0, 1, 1], [], []>} : vector<4x8xf32>, vector<8x384xf32>, vector<4x384xf32> -> vector<4x384xf32>
    %c0_84 = arith.constant 0 : index
    %c0_85 = arith.constant 0 : index
    %89 = vector.load %arg5[%c0_84, %c0_85] : memref<4x1xf32, #tpu.memory_space<vmem>>, vector<4x1xf32>
    %90 = vector.broadcast %89 : vector<4x1xf32> to vector<4x384xf32>
    %91 = arith.addf %88, %90 : vector<4x384xf32>
    %c0_86 = arith.constant 0 : index
    %c0_87 = arith.constant 0 : index
    %c0_88 = arith.constant 0 : index
    %92 = vector.load %arg6[%c0_86, %c0_87, %c0_88] : memref<1x4x384xf32, #tpu.memory_space<vmem>>, vector<1x4x384xf32>
    %93 = vector.shape_cast %92 : vector<1x4x384xf32> to vector<4x384xf32>
    %94 = vector.shape_cast %91 : vector<4x384xf32> to vector<1x4x384xf32>
    tpu.vector_store %arg6[%c0_86, %c0_87, %c0_88], %94 {strides = array<i32>} : memref<1x4x384xf32, #tpu.memory_space<vmem>>, vector<1x4x384xf32>,
    return
  }
  func.func @transform_0(%arg0: i32) -> (i32, i32, i32) {
    %c0_i32 = arith.constant 0 : i32
    %c0_i32_0 = arith.constant 0 : i32
    %c0_i32_1 = arith.constant 0 : i32
    return %arg0, %c0_i32, %c0_i32_0 : i32, i32, i32
  }
  func.func @transform_1(%arg0: i32) -> (i32, i32) {
    %c0_i32 = arith.constant 0 : i32
    %c0_i32_0 = arith.constant 0 : i32
    %c0_i32_1 = arith.constant 0 : i32
    return %c0_i32, %c0_i32_0 : i32, i32
  }
  func.func @transform_2(%arg0: i32) -> (i32, i32) {
    %c0_i32 = arith.constant 0 : i32
    %c0_i32_0 = arith.constant 0 : i32
    %c0_i32_1 = arith.constant 0 : i32
    return %c0_i32, %c0_i32_0 : i32, i32
  }
  func.func @transform_3(%arg0: i32) -> (i32, i32) {
    %c0_i32 = arith.constant 0 : i32
    %c0_i32_0 = arith.constant 0 : i32
    %c0_i32_1 = arith.constant 0 : i32
    return %c0_i32, %c0_i32_0 : i32, i32
  }
  func.func @transform_4(%arg0: i32) -> (i32, i32) {
    %c0_i32 = arith.constant 0 : i32
    %c0_i32_0 = arith.constant 0 : i32
    %c0_i32_1 = arith.constant 0 : i32
    return %c0_i32, %c0_i32_0 : i32, i32
  }
  func.func @transform_5(%arg0: i32) -> (i32, i32, i32) {
    %c0_i32 = arith.constant 0 : i32
    %c0_i32_0 = arith.constant 0 : i32
    %c0_i32_1 = arith.constant 0 : i32
    return %arg0, %c0_i32, %c0_i32_0 : i32, i32, i32
  }
}

</mosaic_0001>

<bundles_post_ra>
// kernel: tpu_custom_call.1
= control target key start
LH: loop header
LB: loop body
LE: loop exit
PB: predicated region body
PF: predicated region fallthrough
CT: control target
= control target key end

     0   :  { %10 = vsyncpa [#allocation6], 0  ;;  %s1886_s0 = inlined_call_operand.vmem [shape: bf16[2,12,256], index: 0, kind: input, shape index: {}]   ;;  %s1887_s1 = inlined_call_operand.vmem [shape: bf16[8,144], index: 1, kind: input, shape index: {}]   ;;  %s1888_s2 = inlined_call_operand.vmem [shape: f32[8,1], index: 2, kind: input, shape index: {}]   ;;  %s1889_s3 = inlined_call_operand.vmem [shape: f32[4,8], index: 3, kind: input, shape index: {}]   ;;  %s1890_s4 = inlined_call_operand.vmem [shape: f32[4,1], index: 4, kind: input, shape index: {}]   ;;  %s1891_s5 = inlined_call_operand.hbm [shape: f32[2,4,384], index: 5, kind: output, shape index: {}]  }
   0x1   :  { %12 = vsyncpa [#allocation6 + $0x1], 0  ;;  %s1602_s18 = smov 0   ;;  %s1604_s19 = smov 0  }
   0x2   :  { %s1606_s20 = smov 0   ;;  %s1608_s21 = smov 0  }
   0x3 LB: > { %s1623_s22 = sadd.s32 4294967295, %s1545_s21   ;;  %s1263_s23 = sadd.s32 4294967294, %s1545_s21   ;;  %s1545_s21 = sphi %s1608_s21, %s1915_s21   ;;  %s1541_s20 = sphi %s1606_s20, %s1914_s20   ;;  %s1537_s19 = sphi %s1604_s19, %s1913_s19   ;;  %s1533_s18 = sphi %s1602_s18, %s1912_s18  }
   0x4   : > { %s1627_s24 = sadd.s32 1, %s1545_s21   ;;  %s135_s25 = sadd.s32 1, %s1541_s20 }
   0x5   : > { %s132_s26 = ssub.s32 %s1545_s21, %s1627_s24  ;;  %p145_p0 = scmp.ne.s32.totalorder %s1541_s20, %s1537_s19 }
   0x6   : > { %p133_p1 = scmp.eq.s32.totalorder %s132_s26, 0  ;;  %p146_p2 = scmp.eq.s32.totalorder %s1623_s22, 1 }
   0x7   : > { %p151_p3 = scmp.ne.s32.totalorder %s1537_s19, %s1533_s18  ;;  %p152_p4 = scmp.eq.s32.totalorder %s1263_s23, 1 }
   0x8   : > { %s1638_s27 = scalar_select %p133_p1, %s1541_s20, %s135_s25  }
   0x9   : > { %p1640_p5 = por %p146_p2, %p145_p0  ;;  %p1644_p6 = por %p152_p4, %p151_p3 }
   0xa   : > { %p1266_p7 = scmp.ge.s32.totalorder %s1545_s21, 1  ;;  %p190_p8 = scmp.lt.s32.totalorder %s1545_s21, 3 }
   0xc   : > { %p191_p9 = pnand %p1266_p7, %p190_p8 }
   0xd   : > { %p218_p10 = scmp.lt.s32.totalorder (!%p191_p9), %s1623_s22, 1  ;;  %s1547_s10 = smov (!%p191_p9), 19  }
   0xe   : > { %194 = sbr.rel (%p191_p9) target bundleno = 729 (0x2d9), region = 40  ;;  %s1548_s11 = smov (!%p191_p9), 21  }
   0xf   : > { %s1549_s12 = smov (!%p191_p9), 23   ;;  %s1550_s13 = smov (!%p191_p9), 25  }
  0x10   : > { %s1551_s14 = smov (!%p191_p9), 27   ;;  %s1552_s15 = smov (!%p191_p9), 31  }
  0x11   : > { %s1553_s16 = smov (!%p191_p9), 29   ;;  %s1554_s17 = smov (!%p191_p9), 33  }
  0x12   : > { %s1555_s23 = smov (!%p191_p9), 35   ;;  %s1556_s25 = smov (!%p191_p9), 37  }
  0x13   : > { %s219_s30 = scalar_select %p218_p10, %s1623_s22, 1  ;;  %vm251_vm0 = vcmask 1042434   ;;  %vm252_vm1 = vsmask.f32 2304  ;;  %vm255_vm2 = vsmask.f32 6400 }
  0x14   : > { %vm282_vm3 = vcmask 1043459   ;;  %vm283_vm4 = vsmask.f32 3328  ;;  %vm254_vm5 = vcmask 1046534   ;;  %vm285_vm6 = vcmask 1047559   ;;  %vm1668_vm10 = vmand %vm251_vm0, %vm252_vm1  ;;  %s1557_s26 = smov 39  }
  0x15   : > { %s1386_s6 = sshll.u32 %s219_s30, 4  ;;  %vm286_vm7 = vsmask.f32 7424  ;;  %vm1657_vm8 = vmand %vm282_vm3, %vm283_vm4  ;;  %v289_v26 = vld [vmem:[#allocation2 + $0x8] sm:$0x88]  ;;  %s1558_s30 = smov 45  }
  0x16   : > { %s222_s9 = scalar_lea.vmem %s1886_s0, %s1386_s6  ;;  %vm1662_vm9 = vmand %vm285_vm6, %vm286_vm7  ;;  %v258_v34 = vld [vmem:[#allocation2 + $0x8] sm:$0x44]  ;;  %vm307_vm14 = vsmask.f32 7950  ;;  %vm309_vm15 = vsmask.f32 7966 }
  0x17   : > { %v224_v0 = vld [vmem:[%s222_s9] sm:$0xff]  ;;  %v225_v1 = vld [vmem:[%s222_s9 + $0x8] sm:$0x33]  ;;  %vm1674_vm11 = vmand %vm254_vm5, %vm255_vm2  ;;  %vm263_vm1 = vsmask.f32 7946  ;;  %s1560_s6 = smov 41  }
  0x18   : > { %226 = vst [vmem:[#allocation2] sm:$0xff] %v224_v0  ;;  %v228_v2 = vunpack.c.l.bf16 %v224_v0  ;;  %v229_v3 = vunpack.c.h.bf16 %v224_v0  ;;  %v271_v4 = vunpack.c.l.bf16 %v225_v1  ;;  %v272_v5 = vunpack.c.h.bf16 %v225_v1  ;;  %vm288_vm12 = vmor %vm1662_vm9, %vm1657_vm8  ;;  %s1561_s7 = smov 43   ;;  %s1562_s8 = smov 47  }
  0x19   : > { %227 = vst [vmem:[#allocation2 + $0x8] sm:$0x33] %v225_v1  ;;  %vm257_vm13 = vmor %vm1674_vm11, %vm1668_vm10  ;;  %vm265_vm2 = vsmask.f32 7962  ;;  %s1563_s9 = smov 49   ;;  %vm355_vm10 = vcmask 576952  }
  0x1a   : > { %v232_v6 = vrot.slane %v228_v2, 1  ;;  %v233_v7 = vrot.slane %v229_v3, 1  ;;  %v241_v8 = vrot.slane %v228_v2, 2  ;;  %v242_v9 = vrot.slane %v229_v3, 2  ;;  %vm1695_vm4 = vmand %vm282_vm3, %vm307_vm14 }
  0x1b   : > { %v275_v10 = vrot.slane %v271_v4, 2  ;;  %v276_v11 = vrot.slane %v272_v5, 2  ;;  %v292_v13 = vrot.slane %v271_v4, 1  ;;  %v293_v14 = vrot.slane %v272_v5, 1  ;;  %vm1700_vm7 = vmand %vm285_vm6, %vm309_vm15 }
  0x1c   : > { %v236_v15 = vmax.f32 %v228_v2, %v232_v6  ;;  %v237_v16 = vmax.f32 %v229_v3, %v233_v7  ;;  %vm1705_vm8 = vmand %vm251_vm0, %vm263_vm1  ;;  %v1559_v6 = vmov 0   ;;  %vm342_vm6 = vcmask 429352  }
  0x1d   : > { %v296_v19 = vmax.f32 %v271_v4, %v292_v13  ;;  %v297_v20 = vmax.f32 %v272_v5, %v293_v14  ;;  %vm1710_vm9 = vmand %vm254_vm5, %vm265_vm2  ;;  %315 = vst [vmem:[#allocation3] sm:$0xff] %v1559_v6  ;;  %1480 = vset.pattern.permute.xlu1 %v1559_v6  ;;  %1481 = vset.pattern.permute.xlu2 %v1559_v6  ;;  %vm329_vm5 = vcmask 281752   ;;  %vm368_vm11 = vcmask 724552  }
  0x1e   : > { %v245_v21 = vmax.f32 %v236_v15, %v241_v8  ;;  %v246_v22 = vmax.f32 %v237_v16, %v242_v9  ;;  %v279_v24 = vmax.f32 %v236_v15, %v275_v10  ;;  %v280_v25 = vmax.f32 %v237_v16, %v276_v11  ;;  %vm311_vm0 = vmor %vm1700_vm7, %vm1695_vm4  ;;  %316 = vst [vmem:[#allocation3 + $0x8] sm:$0xff] %v1559_v6 }
  0x1f   : > { %v319_v27 = vld [vmem:[#allocation2] sm:$0xf]  ;;  %v301_v29 = vmax.f32 %v296_v19, %v275_v10  ;;  %v302_v30 = vmax.f32 %v297_v20, %v276_v11  ;;  %vm267_vm3 = vmor %vm1710_vm9, %vm1705_vm8  ;;  %v430_v63 = vld [vmem:[#allocation2 + $0x4] sm:$0xf]  ;;  %1482 = vset.pattern.permute.xlu0 %v1559_v6  ;;  %317 = vst [vmem:[#allocation3 + $0x10] sm:$0xff] %v1559_v6  ;;  %vm413_vm14 = vcmask 121860  }
  0x20   : > { %v332_v28 = vld [vmem:[#allocation2] sm:$0xf]  ;;  %323 = vrot.lane.b32.xlu0 %v319_v27, %s1547_s10  ;;  %v247_v31 = vpack.c.bf16 %v246_v22, %v245_v21  ;;  %v281_v32 = vpack.c.bf16 %v280_v25, %v279_v24  ;;  %v443_v0 = vld [vmem:[#allocation2 + $0x4] sm:$0xf]  ;;  %318 = vst [vmem:[#allocation3 + $0x18] sm:$0xff] %v1559_v6  ;;  %vm407_vm15 = vcmask 252928  }
  0x21   : > { %336 = vrot.lane.b32.xlu1 %v332_v28, %s1548_s11  ;;  %v345_v33 = vld [vmem:[#allocation2] sm:$0xf]  ;;  %v303_v37 = vpack.c.bf16 %v302_v30, %v301_v29  ;;  %v456_v1 = vld [vmem:[#allocation2 + $0x4] sm:$0xf]  ;;  %vm394_vm1 = vcmask 1019752   ;;  %vm427_vm4 = vcmask 265352  }
  0x22   : > { %349 = vrot.lane.b32.xlu2 %v345_v33, %s1549_s12  ;;  %v249_v35 = vrot.slane %v247_v31, 6  ;;  %v290_v36 = vsel %vm288_vm12, %v281_v32, %v289_v26  ;;  %v358_v40 = vld [vmem:[#allocation2] sm:$0xf]  ;;  %v261_v47 = vrot.slane %v247_v31, 7  ;;  %v495_v5 = vld [vmem:[#allocation2 + $0x4] sm:$0xf] }
  0x23   : > { %291 = vst [vmem:[#allocation2 + $0x8] sm:$0x88] %v290_v36  ;;  %v371_v41 = vld [vmem:[#allocation2] sm:$0xf]  ;;  %v305_v46 = vrot.slane %v303_v37, 5  ;;  %vm381_vm12 = vcmask 872152  }
  0x24   : > { %v259_v38 = vsel %vm257_vm13, %v249_v35, %v258_v34  ;;  %v397_v44 = vld [vmem:[#allocation2] sm:$0xf]  ;;  %v469_v7 = vld [vmem:[#allocation2 + $0x4] sm:$0xf]  ;;  %vm412_vm13 = vcmask 1044472   ;;  %vm440_vm7 = vcmask 412952  }
  0x25   : > { %260 = vst [vmem:[#allocation2 + $0x8] sm:$0x44] %v259_v38  ;;  %v384_v51 = vld [vmem:[#allocation2] sm:$0xf]  ;;  %v482_v8 = vld [vmem:[#allocation2 + $0x4] sm:$0xf]  ;;  %vm1732_vm2 = vmor %vm413_vm14, %vm412_vm13 }
  0x26   : > { %v417_v53 = vld [vmem:[#allocation2] sm:$0xf]  ;;  %v515_v12 = vld [vmem:[#allocation2 + $0x4] sm:$0xf]  ;;  %vm453_vm8 = vcmask 560552   ;;  %vm466_vm9 = vcmask 708152  }
  0x27   : > { %v528_v13 = vld [vmem:[#allocation2 + $0x4] sm:$0xf]  ;;  %vm538_vm13 = vcmask 396552   ;;  %vm711_vm14 = vcmask 883712  }
  0x28   : > { %362 = vrot.lane.b32.xlu0 %v358_v40, %s1550_s13 }
  0x29   : > { %375 = vrot.lane.b32.xlu1 %v371_v41, %s1551_s14 }
  0x2a   : > { %401 = vrot.lane.b32.xlu2 %v397_v44, %s1552_s15  ;;  %v312_v48 = vld [vmem:[#allocation2 + $0x8] sm:$0x88] }
  0x2b   : > { %v313_v49 = vsel %vm311_vm0, %v305_v46, %v312_v48  ;;  %vm510_vm0 = vcmask 1044456  }
  0x2c   : > { %v268_v50 = vld [vmem:[#allocation2 + $0x8] sm:$0x44]  ;;  %314 = vst [vmem:[#allocation2 + $0x8] sm:$0x88] %v313_v49 }
  0x2d   : > { %v269_v52 = vsel %vm267_vm3, %v261_v47, %v268_v50  ;;  %vm511_vm3 = vcmask 105476  }
  0x2e   : > { %270 = vst [vmem:[#allocation2 + $0x8] sm:$0x44] %v269_v52 }
  0x30   : > { %388 = vrot.lane.b32.xlu0 %v384_v51, %s1553_s16 }
  0x32   : > { %421 = vrot.lane.b32.xlu2 %v417_v53, %s1554_s17 }
  0x35   : > { %v333_v54 = vld [vmem:[#allocation2 + $0x8] sm:$0xf]  ;;  %v431_v62 = vld [vmem:[#allocation2 + $0xc] sm:$0xf] }
  0x36   : > { %v320_v55 = vld [vmem:[#allocation2 + $0x8] sm:$0xf]  ;;  %338 = vrot.lane.b32.xlu1 %v333_v54, %s1548_s11  ;;  %v444_v2 = vld [vmem:[#allocation2 + $0xc] sm:$0xf]  ;;  %s1565_s11 = smov 92  }
  0x37   : > { %v346_v56 = vld [vmem:[#allocation2 + $0x8] sm:$0xf]  ;;  %v457_v3 = vld [vmem:[#allocation2 + $0xc] sm:$0xf] }
  0x38   : > { %325 = vrot.lane.b32.xlu0 %v320_v55, %s1547_s10  ;;  %v359_v57 = vld [vmem:[#allocation2 + $0x8] sm:$0xf]  ;;  %v496_v4 = vld [vmem:[#allocation2 + $0xc] sm:$0xf]  ;;  %s1564_s10 = smov 91  }
  0x39   : > { %v398_v58 = vld [vmem:[#allocation2 + $0x8] sm:$0xf]  ;;  %v470_v9 = vld [vmem:[#allocation2 + $0xc] sm:$0xf] }
  0x3a   : > { %351 = vrot.lane.b32.xlu2 %v346_v56, %s1549_s12  ;;  %v372_v59 = vld [vmem:[#allocation2 + $0x8] sm:$0xf]  ;;  %v483_v10 = vld [vmem:[#allocation2 + $0xc] sm:$0xf]  ;;  %s1566_s12 = smov 108  }
  0x3b   : > { %v385_v60 = vld [vmem:[#allocation2 + $0x8] sm:$0xf]  ;;  %v516_v11 = vld [vmem:[#allocation2 + $0xc] sm:$0xf] }
  0x3c   : > { %v418_v61 = vld [vmem:[#allocation2 + $0x8] sm:$0xf]  ;;  %v529_v14 = vld [vmem:[#allocation2 + $0xc] sm:$0xf] }
  0x3e   : > { %364 = vrot.lane.b32.xlu1 %v359_v57, %s1550_s13  ;;  %s1567_s13 = smov 109  }
  0x40   : > { %403 = vrot.lane.b32.xlu0 %v398_v58, %s1552_s15  ;;  %s1569_s15 = smov 126  }
  0x42   : > { %377 = vrot.lane.b32.xlu2 %v372_v59, %s1551_s14  ;;  %s1568_s14 = smov 110  }
  0x46   : > { %390 = vrot.lane.b32.xlu1 %v385_v60, %s1553_s16  ;;  %s1570_s16 = smov 127  }
  0x48   : > { %423 = vrot.lane.b32.xlu0 %v418_v61, %s1554_s17  ;;  %s1571_s17 = smov 90  }
  0x4a   : > { %436 = vrot.lane.b32.xlu2 %v431_v62, %s1555_s23 }
  0x4e   : > { %434 = vrot.lane.b32.xlu1 %v430_v63, %s1555_s23 }
  0x50   : > { %447 = vrot.lane.b32.xlu0 %v443_v0, %s1556_s25 }
  0x52   : > { %460 = vrot.lane.b32.xlu2 %v456_v1, %s1557_s26 }
  0x56   : > { %449 = vrot.lane.b32.xlu1 %v444_v2, %s1556_s25 }
  0x58   : > { %462 = vrot.lane.b32.xlu0 %v457_v3, %s1557_s26 }
  0x5a   : > { %501 = vrot.lane.b32.xlu2 %v496_v4, %s1558_s30 }
  0x5e   : > { %499 = vrot.lane.b32.xlu1 %v495_v5, %s1558_s30 }
  0x60   : > { %473 = vrot.lane.b32.xlu0 %v469_v7, %s1560_s6 }
  0x62   : > { %486 = vrot.lane.b32.xlu2 %v482_v8, %s1561_s7 }
  0x66   : > { %475 = vrot.lane.b32.xlu1 %v470_v9, %s1560_s6 }
  0x68   : > { %488 = vrot.lane.b32.xlu0 %v483_v10, %s1561_s7  ;;  %s1503_s7 = scalar_lea.hbm %s1891_s5, 24 }
  0x6a   : > { %521 = vrot.lane.b32.xlu2 %v516_v11, %s1562_s8 }
  0x6e   : > { %519 = vrot.lane.b32.xlu1 %v515_v12, %s1562_s8 }
  0x70   : > { %532 = vrot.lane.b32.xlu0 %v528_v13, %s1563_s9 }
  0x76   : > { %534 = vrot.lane.b32.xlu1 %v529_v14, %s1563_s9 }
  0x7c   : > { %v350_v15 = vpop.permute.xlu2 %349 }
  0x84   : > { %v402_v16 = vpop.permute.xlu2 %401 }
  0x85   : > { %v405_v22 = vrot.slane %v402_v16, 4 }
  0x87   : > { %v408_v26 = vsel %vm407_vm15, %v405_v22, %v402_v16 }
  0x8c   : > { %v422_v19 = vpop.permute.xlu2 %421 }
  0x92   : > { %v324_v17 = vpop.permute.xlu0 %323 }
  0x93   : > { %v337_v18 = vpop.permute.xlu1 %336  ;;  %330 = vst.msk [vmem:[#allocation3] sm:$0xf] %vm329_vm5, %v324_v17 }
  0x94   : > { %343 = vst.msk [vmem:[#allocation3] sm:$0xf] %vm342_vm6, %v337_v18  ;;  %v352_v24 = vpop.permute.xlu2 %351 }
  0x95   : > { %356 = vst.msk [vmem:[#allocation3] sm:$0xf] %vm355_vm10, %v350_v15 }
  0x9a   : > { %v363_v20 = vpop.permute.xlu0 %362 }
  0x9b   : > { %v376_v21 = vpop.permute.xlu1 %375  ;;  %369 = vst.msk [vmem:[#allocation3] sm:$0xf] %vm368_vm11, %v363_v20 }
  0x9c   : > { %382 = vst.msk [vmem:[#allocation3] sm:$0xf] %vm381_vm12, %v376_v21  ;;  %v378_v29 = vpop.permute.xlu2 %377 }
  0xa2   : > { %v389_v25 = vpop.permute.xlu0 %388 }
  0xa3   : > { %395 = vst.msk [vmem:[#allocation3] sm:$0xf] %vm394_vm1, %v389_v25 }
  0xa4   : > { %415 = vst.msk [vmem:[#allocation3] sm:$0xff] %vm1732_vm2, %v408_v26  ;;  %v437_v33 = vpop.permute.xlu2 %436 }
  0xa5   : > { %428 = vst.msk [vmem:[#allocation3 + $0x4] sm:$0xf] %vm427_vm4, %v422_v19 }
  0xa8   : > { %v339_v27 = vpop.permute.xlu1 %338 }
  0xaa   : > { %v326_v28 = vpop.permute.xlu0 %325 }
  0xab   : > { %331 = vst.msk [vmem:[#allocation3 + $0x10] sm:$0xf] %vm329_vm5, %v326_v28  ;;  %vm479_vm5 = vcmask 855752  }
  0xac   : > { %344 = vst.msk [vmem:[#allocation3 + $0x10] sm:$0xf] %vm342_vm6, %v339_v27  ;;  %v461_v37 = vpop.permute.xlu2 %460  ;;  %vm492_vm6 = vcmask 1003352  }
  0xad   : > { %357 = vst.msk [vmem:[#allocation3 + $0x10] sm:$0xf] %vm355_vm10, %v352_v24  ;;  %vm505_vm10 = vcmask 367616  }
  0xb0   : > { %v365_v30 = vpop.permute.xlu1 %364 }
  0xb1   : > { %370 = vst.msk [vmem:[#allocation3 + $0x10] sm:$0xf] %vm368_vm11, %v365_v30  ;;  %vm512_vm11 = vmor %vm511_vm3, %vm510_vm0  ;;  %vm816_vm0 = vcmask 736256   ;;  %vm1023_vm3 = vcmask 130048  }
  0xb2   : > { %383 = vst.msk [vmem:[#allocation3 + $0x10] sm:$0xf] %vm381_vm12, %v378_v29  ;;  %v404_v31 = vpop.permute.xlu0 %403  ;;  %vm525_vm12 = vcmask 248952  }
  0xb3   : > { %v406_v32 = vrot.slane %v404_v31, 4 }
  0xb4   : > { %v502_v41 = vpop.permute.xlu2 %501 }
  0xb5   : > { %v409_v35 = vsel %vm407_vm15, %v406_v32, %v404_v31  ;;  %v504_v48 = vrot.slane %v502_v41, 4  ;;  %vm606_vm15 = vcmask 1031168  }
  0xb7   : > { %v507_v52 = vsel %vm505_vm10, %v504_v48, %v502_v41 }
  0xb8   : > { %v391_v34 = vpop.permute.xlu1 %390 }
  0xb9   : > { %396 = vst.msk [vmem:[#allocation3 + $0x10] sm:$0xf] %vm394_vm1, %v391_v34  ;;  %vm569_vm1 = vcmask 1043456  }
  0xba   : > { %416 = vst.msk [vmem:[#allocation3 + $0x10] sm:$0xff] %vm1732_vm2, %v409_v35  ;;  %v424_v36 = vpop.permute.xlu0 %423  ;;  %vm781_vm2 = vcmask 744448  }
  0xbb   : > { %429 = vst.msk [vmem:[#allocation3 + $0x14] sm:$0xf] %vm427_vm4, %v424_v36  ;;  %vm746_vm4 = vcmask 752640  }
  0xbc   : > { %442 = vst.msk [vmem:[#allocation3 + $0x14] sm:$0xf] %vm440_vm7, %v437_v33  ;;  %v487_v45 = vpop.permute.xlu2 %486 }
  0xc0   : > { %v435_v38 = vpop.permute.xlu1 %434 }
  0xc1   : > { %441 = vst.msk [vmem:[#allocation3 + $0x4] sm:$0xf] %vm440_vm7, %v435_v38  ;;  %vm641_vm7 = vcmask 900096  }
  0xc2   : > { %v448_v39 = vpop.permute.xlu0 %447 }
  0xc3   : > { %454 = vst.msk [vmem:[#allocation3 + $0x4] sm:$0xf] %vm453_vm8, %v448_v39 }
  0xc4   : > { %467 = vst.msk [vmem:[#allocation3 + $0x4] sm:$0xf] %vm466_vm9, %v461_v37  ;;  %v522_v51 = vpop.permute.xlu2 %521 }
  0xc8   : > { %v450_v40 = vpop.permute.xlu1 %449 }
  0xc9   : > { %455 = vst.msk [vmem:[#allocation3 + $0x14] sm:$0xf] %vm453_vm8, %v450_v40  ;;  %vm676_vm8 = vcmask 891904  }
  0xca   : > { %v463_v42 = vpop.permute.xlu0 %462 }
  0xcb   : > { %468 = vst.msk [vmem:[#allocation3 + $0x14] sm:$0xf] %vm466_vm9, %v463_v42  ;;  %vm571_vm9 = vcmask 1039360  }
  0xd0   : > { %v500_v43 = vpop.permute.xlu1 %499 }
  0xd1   : > { %v503_v44 = vrot.slane %v500_v43, 4 }
  0xd2   : > { %v474_v46 = vpop.permute.xlu0 %473 }
  0xd3   : > { %v506_v47 = vsel %vm505_vm10, %v503_v44, %v500_v43  ;;  %480 = vst.msk [vmem:[#allocation3 + $0x4] sm:$0xf] %vm479_vm5, %v474_v46 }
  0xd4   : > { %493 = vst.msk [vmem:[#allocation3 + $0x4] sm:$0xf] %vm492_vm6, %v487_v45 }
  0xd5   : > { %513 = vst.msk [vmem:[#allocation3 + $0x4] sm:$0xff] %vm512_vm11, %v506_v47 }
  0xd8   : > { %v476_v49 = vpop.permute.xlu1 %475 }
  0xd9   : > { %481 = vst.msk [vmem:[#allocation3 + $0x14] sm:$0xf] %vm479_vm5, %v476_v49  ;;  %vm1115_vm5 = vcmask 64512  }
  0xda   : > { %v489_v50 = vpop.permute.xlu0 %488 }
  0xdb   : > { %494 = vst.msk [vmem:[#allocation3 + $0x14] sm:$0xf] %vm492_vm6, %v489_v50 }
  0xdc   : > { %514 = vst.msk [vmem:[#allocation3 + $0x14] sm:$0xff] %vm512_vm11, %v507_v52  ;;  %v760_v53 = vld [vmem:[#allocation3] sm:$0xff] }
  0xdd   : > { %768 = vrot.lane.b32.xlu2 %v760_v53, %s1564_s10  ;;  %733 = vrot.lane.b32.xlu0 %v760_v53, %s1565_s11  ;;  %527 = vst.msk [vmem:[#allocation3 + $0x18] sm:$0xf] %vm525_vm12, %v522_v51 }
  0xde   : > { %698 = vrot.lane.b32.xlu1 %v760_v53, %s1566_s12  ;;  %545 = vst [vmem:[#allocation4] sm:$0xff] %v760_v53 }
  0xe0   : > { %v520_v54 = vpop.permute.xlu1 %519 }
  0xe1   : > { %526 = vst.msk [vmem:[#allocation3 + $0x8] sm:$0xf] %vm525_vm12, %v520_v54 }
  0xe2   : > { %v533_v55 = vpop.permute.xlu0 %532 }
  0xe3   : > { %539 = vst.msk [vmem:[#allocation3 + $0x8] sm:$0xf] %vm538_vm13, %v533_v55  ;;  %v692_v56 = vld [vmem:[#allocation3 + $0x10] sm:$0xff] }
  0xe4   : > { %547 = vst [vmem:[#allocation4 + $0xc] sm:$0xff] %v692_v56 }
  0xe5   : > { %663 = vrot.lane.b32.xlu2 %v760_v53, %s1567_s13  ;;  %628 = vrot.lane.b32.xlu0 %v760_v53, %s1568_s14 }
  0xe6   : > { %593 = vrot.lane.b32.xlu1 %v760_v53, %s1569_s15 }
  0xe8   : > { %v535_v57 = vpop.permute.xlu1 %534 }
  0xe9   : > { %540 = vst.msk [vmem:[#allocation3 + $0x18] sm:$0xf] %vm538_vm13, %v535_v57 }
  0xea   : > { %v542_v58 = vld [vmem:[#allocation3 + $0x8] sm:$0xf] }
  0xeb   : > { %v761_v59 = vld [vmem:[#allocation3 + $0x8] sm:$0xff]  ;;  %546 = vst [vmem:[#allocation4 + $0x8] sm:$0xf] %v542_v58 }
  0xed   : > { %770 = vrot.lane.b32.xlu0 %v761_v59, %s1564_s10  ;;  %700 = vrot.lane.b32.xlu2 %v761_v59, %s1566_s12 }
  0xee   : > { %735 = vrot.lane.b32.xlu1 %v761_v59, %s1565_s11 }
  0xf0   : > { %v544_v60 = vld [vmem:[#allocation3 + $0x18] sm:$0xf] }
  0xf1   : > { %548 = vst [vmem:[#allocation4 + $0x14] sm:$0xf] %v544_v60  ;;  %v693_v61 = vld [vmem:[#allocation3 + $0x18] sm:$0xff] }
  0xf5   : > { %665 = vrot.lane.b32.xlu0 %v761_v59, %s1567_s13  ;;  %595 = vrot.lane.b32.xlu2 %v761_v59, %s1569_s15 }
  0xf6   : > { %630 = vrot.lane.b32.xlu1 %v761_v59, %s1568_s14 }
  0xfd   : > { %702 = vrot.lane.b32.xlu0 %v692_v56, %s1566_s12  ;;  %737 = vrot.lane.b32.xlu2 %v692_v56, %s1565_s11 }
  0xfe   : > { %772 = vrot.lane.b32.xlu1 %v692_v56, %s1564_s10 }
 0x105   : > { %597 = vrot.lane.b32.xlu0 %v692_v56, %s1569_s15  ;;  %632 = vrot.lane.b32.xlu2 %v692_v56, %s1568_s14 }
 0x106   : > { %667 = vrot.lane.b32.xlu1 %v692_v56, %s1567_s13 }
 0x10d   : > { %774 = vrot.lane.b32.xlu2 %v693_v61, %s1564_s10  ;;  %559 = vrot.lane.b32.xlu0 %v761_v59, %s1570_s16  ;;  %s215_s10 = sand.u32 1, %s1537_s19  }
 0x10e   : > { %704 = vrot.lane.b32.xlu1 %v693_v61, %s1566_s12  ;;  %s1188_s25 = scalar_lea.sflag [#allocation6], %s215_s10 }
 0x115   : > { %557 = vrot.lane.b32.xlu2 %v760_v53, %s1570_s16  ;;  %739 = vrot.lane.b32.xlu0 %v693_v61, %s1565_s11  ;;  %s1414_s11 = smul.u32 12, %s215_s10 }
 0x116   : > { %561 = vrot.lane.b32.xlu1 %v692_v56, %s1570_s16 }
 0x117   : > { %s217_s12 = scalar_lea.vmem [#allocation5], %s1414_s11 }
 0x11d   : > { %669 = vrot.lane.b32.xlu2 %v693_v61, %s1567_s13  ;;  %634 = vrot.lane.b32.xlu0 %v693_v61, %s1568_s14  ;;  %s1415_s13 = smul.u32 12, %s1623_s22 }
 0x11e   : > { %599 = vrot.lane.b32.xlu1 %v693_v61, %s1569_s15 }
 0x125   : > { %563 = vrot.lane.b32.xlu2 %v693_v61, %s1570_s16  ;;  %803 = vrot.lane.b32.xlu0 %v760_v53, %s1571_s17  ;;  %s1199_s16 = scalar_lea.hbm %s1891_s5, %s1415_s13 }
 0x126   : > { %805 = vrot.lane.b32.xlu1 %v761_v59, %s1571_s17  ;;  %s1203_s23 = sshll.u32 %s1199_s16, 4  ;;  %s1204_s23 = int_to_ptr.hbm [resolvable:$true] %s1203_s23 }
 0x127   : > { %s1497_s26 = sshra.s32 %s1204_s23, 4  ;;  %s1498_s26 = int_to_ptr.hbm [resolvable:$true] %s1497_s26 }
 0x128   : > { %s1499_s30 = scalar_lea.hbm %s1498_s26, 12  ;;  %p1504_p0 = scmp.lt.s32.totalorder %s1498_s26, %s1891_s5 }
 0x129   : > { %p1500_p11 = scmp.ne.s32.totalorder %s1498_s26, %s1499_s30  ;;  %p1505_p1 = scmp.lt.s32.totalorder %s1503_s7, %s1499_s30 }
 0x12b   : > { %p1501_p12 = pnand %p1500_p11, %p1640_p5  ;;  %p1506_p2 = por %p1505_p1, %p1504_p0 }
 0x12d   : > { %807 = vrot.lane.b32.xlu2 %v692_v56, %s1571_s17  ;;  %809 = vrot.lane.b32.xlu0 %v693_v61, %s1571_s17  ;;  %s1201_s17 = sshll.u32 %s217_s12, 4  ;;  %p1502_p13 = pneg %p1501_p12  ;;  %s1202_s17 = int_to_ptr.vmem [resolvable:$true] %s1201_s17 }
 0x12f   : > { %p1507_p3 = pnand %p1506_p2, %p1502_p13 }
 0x137   : > { %v769_v62 = vpop.permute.xlu2 %768 }
 0x138   : > { %v776_v19 = vrot.slane %v769_v62, 4 }
 0x13f   : > { %v664_v63 = vpop.permute.xlu2 %663 }
 0x140   : > { %v671_v30 = vrot.slane %v664_v63, 4 }
 0x147   : > { %v701_v0 = vpop.permute.xlu2 %700 }
 0x148   : > { %v707_v1 = vrot.slane %v701_v0, 4 }
 0x14a   : > { %v713_v2 = vsel %vm711_vm14, %v701_v0, %v707_v1 }
 0x14b   : > { %722 = vst [vmem:[#allocation4 + $0x80] sm:$0xf] %v713_v2 }
 0x14f   : > { %v596_v3 = vpop.permute.xlu2 %595  ;;  %v734_v4 = vpop.permute.xlu0 %733 }
 0x150   : > { %v699_v5 = vpop.permute.xlu1 %698  ;;  %v602_v6 = vrot.slane %v596_v3, 4  ;;  %v741_v22 = vrot.slane %v734_v4, 4 }
 0x151   : > { %v706_v7 = vrot.slane %v699_v5, 4 }
 0x152   : > { %v608_v8 = vsel %vm606_vm15, %v596_v3, %v602_v6 }
 0x153   : > { %v710_v9 = vsel %vm569_vm1, %v706_v7, %v707_v1  ;;  %617 = vst [vmem:[#allocation4 + $0x38] sm:$0xf] %v608_v8 }
 0x154   : > { %v712_v10 = vsel %vm711_vm14, %v699_v5, %v710_v9 }
 0x155   : > { %721 = vst [vmem:[#allocation4 + $0x78] sm:$0xff] %v712_v10 }
 0x157   : > { %v1779_v11 = vpop.permute.xlu2 %737  ;;  %v629_v12 = vpop.permute.xlu0 %628 }
 0x158   : > { %v594_v13 = vpop.permute.xlu1 %593  ;;  %v636_v36 = vrot.slane %v629_v12, 4 }
 0x159   : > { %v601_v14 = vrot.slane %v594_v13, 4 }
 0x15b   : > { %v605_v15 = vsel %vm569_vm1, %v601_v14, %v602_v6 }
 0x15c   : > { %v607_v16 = vsel %vm606_vm15, %v594_v13, %v605_v15 }
 0x15d   : > { %616 = vst [vmem:[#allocation4 + $0x30] sm:$0xff] %v607_v16 }
 0x15f   : > { %v1783_v17 = vpop.permute.xlu2 %632  ;;  %v771_v18 = vpop.permute.xlu0 %770 }
 0x160   : > { %v736_v20 = vpop.permute.xlu1 %735  ;;  %v777_v21 = vrot.slane %v771_v18, 4 }
 0x161   : > { %v742_v23 = vrot.slane %v736_v20, 4 }
 0x162   : > { %v780_v24 = vsel %vm569_vm1, %v776_v19, %v777_v21  ;;  %v783_v25 = vsel %vm781_vm2, %v771_v18, %v777_v21  ;;  %v743_v19 = vrot.slane %v1779_v11, 4 }
 0x163   : > { %v745_v26 = vsel %vm569_vm1, %v741_v22, %v742_v23  ;;  %v748_v27 = vsel %vm746_vm4, %v736_v20, %v742_v23  ;;  %v782_v28 = vsel %vm781_vm2, %v769_v62, %v780_v24  ;;  %792 = vst [vmem:[#allocation4 + $0xb0] sm:$0xf] %v783_v25 }
 0x164   : > { %v747_v29 = vsel %vm746_vm4, %v734_v4, %v745_v26  ;;  %757 = vst [vmem:[#allocation4 + $0x98] sm:$0xf] %v748_v27 }
 0x165   : > { %756 = vst [vmem:[#allocation4 + $0x90] sm:$0xff] %v747_v29  ;;  %v638_v29 = vrot.slane %v1783_v17, 4 }
 0x166   : > { %791 = vst [vmem:[#allocation4 + $0xa8] sm:$0xff] %v782_v28 }
 0x167   : > { %v775_v31 = vpop.permute.xlu2 %774  ;;  %v666_v32 = vpop.permute.xlu0 %665 }
 0x168   : > { %v631_v33 = vpop.permute.xlu1 %630  ;;  %v779_v34 = vrot.slane %v775_v31, 4  ;;  %v672_v35 = vrot.slane %v666_v32, 4 }
 0x169   : > { %v637_v37 = vrot.slane %v631_v33, 4 }
 0x16a   : > { %v786_v38 = vsel %vm781_vm2, %v775_v31, %v779_v34  ;;  %v675_v39 = vsel %vm569_vm1, %v671_v30, %v672_v35  ;;  %v678_v44 = vsel %vm676_vm8, %v666_v32, %v672_v35 }
 0x16b   : > { %v640_v40 = vsel %vm569_vm1, %v636_v36, %v637_v37  ;;  %v643_v41 = vsel %vm641_vm7, %v631_v33, %v637_v37  ;;  %794 = vst [vmem:[#allocation4 + $0xbc] sm:$0xf] %v786_v38  ;;  %v677_v42 = vsel %vm676_vm8, %v664_v63, %v675_v39 }
 0x16c   : > { %v642_v43 = vsel %vm641_vm7, %v629_v12, %v640_v40  ;;  %652 = vst [vmem:[#allocation4 + $0x50] sm:$0xf] %v643_v41  ;;  %v1343_v36 = vld [vmem:[#allocation4 + $0x90] sm:$0xf]  ;;  %v1405_v37 = vld [vmem:[#allocation4 + $0x94] sm:$0xf] }
 0x16d   : > { %651 = vst [vmem:[#allocation4 + $0x48] sm:$0xff] %v642_v43  ;;  %v1355_v58 = vld [vmem:[#allocation4 + $0xa8] sm:$0xf]  ;;  %v1408_v61 = vld [vmem:[#allocation4 + $0xac] sm:$0xf] }
 0x16e   : > { %686 = vst [vmem:[#allocation4 + $0x60] sm:$0xff] %v677_v42 }
 0x16f   : > { %687 = vst [vmem:[#allocation4 + $0x68] sm:$0xf] %v678_v44  ;;  %v558_v45 = vpop.permute.xlu2 %557  ;;  %v703_v46 = vpop.permute.xlu0 %702 }
 0x170   : > { %v773_v47 = vpop.permute.xlu1 %772  ;;  %v565_v3 = vrot.slane %v558_v45, 4  ;;  %v708_v7 = vrot.slane %v703_v46, 4 }
 0x171   : > { %v778_v48 = vrot.slane %v773_v47, 4 }
 0x173   : > { %v784_v49 = vsel %vm569_vm1, %v778_v48, %v779_v34  ;;  %v1331_v48 = vld [vmem:[#allocation4 + $0x78] sm:$0xf] }
 0x174   : > { %v785_v50 = vsel %vm781_vm2, %v773_v47, %v784_v49  ;;  %v1402_v49 = vld [vmem:[#allocation4 + $0x7c] sm:$0xf] }
 0x175   : > { %793 = vst [vmem:[#allocation4 + $0xb4] sm:$0xff] %v785_v50 }
 0x177   : > { %v670_v51 = vpop.permute.xlu2 %669  ;;  %v1800_v52 = vpop.permute.xlu0 %597 }
 0x178   : > { %v668_v53 = vpop.permute.xlu1 %667  ;;  %v674_v54 = vrot.slane %v670_v51, 4  ;;  %v603_v32 = vrot.slane %v1800_v52, 4 }
 0x179   : > { %v673_v55 = vrot.slane %v668_v53, 4 }
 0x17a   : > { %v681_v56 = vsel %vm676_vm8, %v670_v51, %v674_v54 }
 0x17b   : > { %v679_v57 = vsel %vm569_vm1, %v673_v55, %v674_v54  ;;  %689 = vst [vmem:[#allocation4 + $0x74] sm:$0xf] %v681_v56 }
 0x17c   : > { %v680_v59 = vsel %vm676_vm8, %v668_v53, %v679_v57  ;;  %v1409_v60 = vld [vmem:[#allocation4 + $0xb0] sm:$0xf0]  ;;  %v1357_v62 = vld [vmem:[#allocation4 + $0xb4] sm:$0xf0] }
 0x17d   : > { %688 = vst [vmem:[#allocation4 + $0x6c] sm:$0xff] %v680_v59  ;;  %v1356_v63 = vor.u32 %v1409_v60, %v1355_v58  ;;  %v1360_v0 = vor.u32 %v1408_v61, %v1357_v62  ;;  %v1319_v58 = vld [vmem:[#allocation4 + $0x60] sm:$0xf]  ;;  %v1399_v59 = vld [vmem:[#allocation4 + $0x64] sm:$0xf] }
 0x17f   : > { %1027 = vmatpush.bf16.msra.mxu0 %v1356_v63  ;;  %1053 = vmatpush.bf16.msra.mxu2 %v1360_v0  ;;  %v564_v1 = vpop.permute.xlu2 %563  ;;  %v560_v2 = vpop.permute.xlu0 %559 }
 0x180   : > { %v705_v4 = vpop.permute.xlu1 %704  ;;  %v568_v5 = vrot.slane %v564_v1, 4  ;;  %v566_v6 = vrot.slane %v560_v2, 4 }
 0x181   : > { %v709_v8 = vrot.slane %v705_v4, 4 }
 0x182   : > { %v576_v9 = vsel %vm571_vm9, %v564_v1, %v568_v5  ;;  %v570_v10 = vsel %vm569_vm1, %v565_v3, %v566_v6  ;;  %v573_v16 = vsel %vm571_vm9, %v560_v2, %v566_v6  ;;  %v1307_v3 = vld [vmem:[#allocation4 + $0x48] sm:$0xf] }
 0x183   : > { %v714_v12 = vsel %vm569_vm1, %v708_v7, %v709_v8  ;;  %v716_v13 = vsel %vm711_vm14, %v705_v4, %v709_v8  ;;  %584 = vst [vmem:[#allocation4 + $0x2c] sm:$0xf] %v576_v9  ;;  %v572_v14 = vsel %vm571_vm9, %v558_v45, %v570_v10  ;;  %v1396_v4 = vld [vmem:[#allocation4 + $0x4c] sm:$0xf] }
 0x184   : > { %v715_v15 = vsel %vm711_vm14, %v703_v46, %v714_v12  ;;  %724 = vst [vmem:[#allocation4 + $0x8c] sm:$0xf] %v716_v13  ;;  %v1400_v55 = vld [vmem:[#allocation4 + $0x68] sm:$0xf0]  ;;  %v867_v12 = vld [vmem:[%s1888_s2] sm:$0xff] }
 0x185   : > { %723 = vst [vmem:[#allocation4 + $0x84] sm:$0xff] %v715_v15  ;;  %v1320_v61 = vor.u32 %v1400_v55, %v1319_v58  ;;  %870 = vperm.xlu1 %1480, %v867_v12   ;;  %v1401_v55 = vld [vmem:[#allocation4 + $0x70] sm:$0xf0]  ;;  %v1315_v58 = vld [vmem:[#allocation4 + $0x50] sm:$0xf] }
 0x186   : > { %581 = vst [vmem:[#allocation4 + $0x18] sm:$0xff] %v572_v14  ;;  %v1108_v12 = vld [vmem:[%s1889_s3] sm:$0xf] }
 0x187   : > { %582 = vst [vmem:[#allocation4 + $0x20] sm:$0xf] %v573_v16  ;;  %v740_v18 = vpop.permute.xlu0 %739  ;;  %v808_v63 = vpop.permute.xlu2 %807  ;;  %v1295_v16 = vld [vmem:[#allocation4 + $0x30] sm:$0xf] }
 0x188   : > { %v562_v20 = vpop.permute.xlu1 %561  ;;  %v744_v21 = vrot.slane %v740_v18, 4 }
 0x189   : > { %v567_v22 = vrot.slane %v562_v20, 4 }
 0x18a   : > { %v749_v23 = vsel %vm569_vm1, %v743_v19, %v744_v21  ;;  %v751_v24 = vsel %vm746_vm4, %v740_v18, %v744_v21  ;;  %v1393_v18 = vld [vmem:[#allocation4 + $0x34] sm:$0xf] }
 0x18b   : > { %v574_v25 = vsel %vm569_vm1, %v567_v22, %v568_v5  ;;  %v750_v26 = vsel %vm746_vm4, %v1779_v11, %v749_v23  ;;  %759 = vst [vmem:[#allocation4 + $0xa4] sm:$0xf] %v751_v24  ;;  %v813_v5 = vrot.slane %v808_v63, 4  ;;  %v830_v23 = vld [vmem:[%s1887_s1] sm:$0xff] }
 0x18c   : > { %v575_v27 = vsel %vm571_vm9, %v562_v20, %v574_v25  ;;  %758 = vst [vmem:[#allocation4 + $0x9c] sm:$0xff] %v750_v26  ;;  %v1403_v45 = vld [vmem:[#allocation4 + $0x80] sm:$0xf0]  ;;  %v1333_v46 = vld [vmem:[#allocation4 + $0x84] sm:$0xf0] }
 0x18d   : > { %583 = vst [vmem:[#allocation4 + $0x24] sm:$0xff] %v575_v27  ;;  %v1332_v51 = vor.u32 %v1403_v45, %v1331_v48  ;;  %v1336_v53 = vor.u32 %v1402_v49, %v1333_v46  ;;  %v1283_v24 = vld [vmem:[#allocation4 + $0x18] sm:$0xf]  ;;  %v1390_v25 = vld [vmem:[#allocation4 + $0x1c] sm:$0xf] }
 0x18f   : > { %v635_v28 = vpop.permute.xlu0 %634 }
 0x190   : > { %v600_v30 = vpop.permute.xlu1 %599  ;;  %v639_v31 = vrot.slane %v635_v28, 4 }
 0x191   : > { %v604_v33 = vrot.slane %v600_v30, 4 }
 0x192   : > { %v644_v34 = vsel %vm569_vm1, %v638_v29, %v639_v31  ;;  %v646_v35 = vsel %vm641_vm7, %v635_v28, %v639_v31  ;;  %v1271_v28 = vld [vmem:[#allocation4] sm:$0xf]  ;;  %v1388_v29 = vld [vmem:[#allocation4 + $0x8] sm:$0xf0]  ;;  %v874_v31 = vunpack.c.l.b16 %v830_v23  ;;  %v1407_v49 = vld [vmem:[#allocation4 + $0xa0] sm:$0xf0] }
 0x193   : > { %v609_v11 = vsel %vm569_vm1, %v603_v32, %v604_v33  ;;  %v611_v38 = vsel %vm606_vm15, %v600_v30, %v604_v33  ;;  %v645_v39 = vsel %vm641_vm7, %v1783_v17, %v644_v34  ;;  %654 = vst [vmem:[#allocation4 + $0x5c] sm:$0xf] %v646_v35  ;;  %v1406_v40 = vld [vmem:[#allocation4 + $0x98] sm:$0xf0]  ;;  %v1345_v41 = vld [vmem:[#allocation4 + $0x9c] sm:$0xf0]  ;;  %v875_v35 = vunpack.c.h.b16 %v830_v23 }
 0x194   : > { %v610_v42 = vsel %vm606_vm15, %v1800_v52, %v609_v11  ;;  %619 = vst [vmem:[#allocation4 + $0x44] sm:$0xf] %v611_v38  ;;  %v1344_v43 = vor.u32 %v1406_v40, %v1343_v36  ;;  %v1348_v44 = vor.u32 %v1405_v37, %v1345_v41  ;;  %v1321_v52 = vld [vmem:[#allocation4 + $0x6c] sm:$0xf0]  ;;  %v1391_v21 = vld [vmem:[#allocation4 + $0x20] sm:$0xf0]  ;;  %v1272_v38 = vor.u32 %v1388_v29, %v1271_v28 }
 0x195   : > { %618 = vst [vmem:[#allocation4 + $0x3c] sm:$0xff] %v610_v42  ;;  %v1324_v62 = vor.u32 %v1399_v59, %v1321_v52  ;;  %v1285_v22 = vld [vmem:[#allocation4 + $0x24] sm:$0xf0]  ;;  %v1284_v26 = vor.u32 %v1391_v21, %v1283_v24  ;;  %v1273_v30 = vld [vmem:[#allocation4 + $0xc] sm:$0xf0]  ;;  %v876_v45 = vpack.c.b16 %v874_v31, %v874_v31  ;;  %v877_v48 = vpack.c.b16 %v875_v35, %v875_v35 }
 0x196   : > { %653 = vst [vmem:[#allocation4 + $0x54] sm:$0xff] %v645_v39  ;;  %1028 = vmatpush.bf16.msra.mxu0 %v1344_v43  ;;  %1054 = vmatpush.bf16.msra.mxu2 %v1348_v44  ;;  %v1288_v27 = vor.u32 %v1390_v25, %v1285_v22  ;;  %v1410_v34 = vld [vmem:[#allocation4 + $0xb8] sm:$0xf0]  ;;  %v1387_v40 = vld [vmem:[#allocation4 + $0x4] sm:$0xf] }
 0x197   : > { %v804_v47 = vpop.permute.xlu0 %803  ;;  %v1276_v42 = vor.u32 %v1387_v40, %v1273_v30  ;;  %v1363_v43 = vld [vmem:[#allocation4 + $0xb0] sm:$0xf]  ;;  %v1327_v52 = vld [vmem:[#allocation4 + $0x68] sm:$0xf] }
 0x198   : > { %v806_v17 = vpop.permute.xlu1 %805  ;;  %v811_v50 = vrot.slane %v804_v47, 4  ;;  %v1364_v46 = vor.u32 %v1410_v34, %v1363_v43 }
 0x199   : > { %v812_v54 = vrot.slane %v806_v17, 4 }
 0x19a   : > { %1029 = vmatpush.bf16.msra.mxu0 %v1332_v51  ;;  %1055 = vmatpush.bf16.msra.mxu2 %v1336_v53  ;;  %v1404_v51 = vld [vmem:[#allocation4 + $0x88] sm:$0xf0]  ;;  %v1339_v53 = vld [vmem:[#allocation4 + $0x80] sm:$0xf] }
 0x19b   : > { %v818_v56 = vsel %vm816_vm0, %v806_v17, %v812_v54  ;;  %v815_v57 = vsel %vm569_vm1, %v811_v50, %v812_v54  ;;  %v1351_v17 = vld [vmem:[#allocation4 + $0x98] sm:$0xf]  ;;  %v1340_v54 = vor.u32 %v1404_v51, %v1339_v53 }
 0x19c   : > { %827 = vst [vmem:[#allocation4 + $0xc8] sm:$0xf] %v818_v56  ;;  %v817_v60 = vsel %vm816_vm0, %v804_v47, %v815_v57  ;;  %v1394_v9 = vld [vmem:[#allocation4 + $0x38] sm:$0xf0]  ;;  %v1297_v10 = vld [vmem:[#allocation4 + $0x3c] sm:$0xf0]  ;;  %v1352_v50 = vor.u32 %v1407_v49, %v1351_v17  ;;  %v1328_v56 = vor.u32 %v1401_v55, %v1327_v52 }
 0x19d   : > { %826 = vst [vmem:[#allocation4 + $0xc0] sm:$0xff] %v817_v60  ;;  %v1397_v0 = vld [vmem:[#allocation4 + $0x50] sm:$0xf0]  ;;  %v1309_v1 = vld [vmem:[#allocation4 + $0x54] sm:$0xf0]  ;;  %v1296_v19 = vor.u32 %v1394_v9, %v1295_v16  ;;  %v1300_v20 = vor.u32 %v1393_v18, %v1297_v10 }
 0x19e   : > { %1030 = vmatpush.bf16.msra.mxu0 %v1320_v61  ;;  %1056 = vmatpush.bf16.msra.mxu2 %v1324_v62  ;;  %v1308_v7 = vor.u32 %v1397_v0, %v1307_v3  ;;  %v1312_v8 = vor.u32 %v1396_v4, %v1309_v1  ;;  %v1398_v57 = vld [vmem:[#allocation4 + $0x58] sm:$0xf0]  ;;  %v1395_v60 = vld [vmem:[#allocation4 + $0x40] sm:$0xf0]  ;;  %v1303_v61 = vld [vmem:[#allocation4 + $0x38] sm:$0xf] }
 0x19f   : > { %v810_v2 = vpop.permute.xlu0 %809  ;;  %v1316_v59 = vor.u32 %v1398_v57, %v1315_v58  ;;  %v1304_v62 = vor.u32 %v1395_v60, %v1303_v61  ;;  %v1392_v0 = vld [vmem:[#allocation4 + $0x28] sm:$0xf0]  ;;  %v1279_v3 = vld [vmem:[#allocation4 + $0x8] sm:$0xf] }
 0x1a0   : > { %v814_v6 = vrot.slane %v810_v2, 4 }
 0x1a2   : > { %v819_v13 = vsel %vm569_vm1, %v813_v5, %v814_v6  ;;  %v821_v14 = vsel %vm816_vm0, %v810_v2, %v814_v6  ;;  %1031 = vmatpush.bf16.msra.mxu0 %v1308_v7  ;;  %1057 = vmatpush.bf16.msra.mxu2 %v1312_v8  ;;  %v1389_v2 = vld [vmem:[#allocation4 + $0x10] sm:$0xf0] }
 0x1a3   : > { %v820_v15 = vsel %vm816_vm0, %v808_v63, %v819_v13  ;;  %829 = vst [vmem:[#allocation4 + $0xd4] sm:$0xf] %v821_v14  ;;  %v1375_v44 = vld [vmem:[#allocation4 + $0xc8] sm:$0xf]  ;;  %v1291_v63 = vld [vmem:[#allocation4 + $0x20] sm:$0xf]  ;;  %v1280_v4 = vor.u32 %v1389_v2, %v1279_v3 }
 0x1a4   : > { %828 = vst [vmem:[#allocation4 + $0xcc] sm:$0xff] %v820_v15  ;;  %v1367_v32 = vld [vmem:[#allocation4 + $0xc0] sm:$0xf]  ;;  %v1411_v33 = vld [vmem:[#allocation4 + $0xc4] sm:$0xf]  ;;  %v1292_v1 = vor.u32 %v1392_v0, %v1291_v63 }
 0x1a5   : > { %v1109_v13 = vld [vmem:[%s1890_s4] sm:$0xf] }
 0x1a6   : > { %1032 = vmatpush.bf16.msra.mxu0 %v1296_v19  ;;  %1058 = vmatpush.bf16.msra.mxu2 %v1300_v20 }
 0x1a7   : > { %1112 = vperm.xlu2 %1481, %v1109_v13  }
 0x1aa   : > { %1033 = vmatpush.bf16.msra.mxu0 %v1284_v26  ;;  %1059 = vmatpush.bf16.msra.mxu2 %v1288_v27  ;;  %v1413_v11 = vld [vmem:[#allocation4 + $0xd0] sm:$0xf0] }
 0x1ab   : > { %v1412_v36 = vld [vmem:[#allocation4 + $0xc8] sm:$0xf0]  ;;  %v1369_v37 = vld [vmem:[#allocation4 + $0xcc] sm:$0xf0]  ;;  %v1376_v47 = vor.u32 %v1413_v11, %v1375_v44 }
 0x1ac   : > { %v1368_v39 = vor.u32 %v1412_v36, %v1367_v32  ;;  %v1372_v41 = vor.u32 %v1411_v33, %v1369_v37 }
 0x1ae   : > { %1034 = vmatpush.bf16.msra.mxu0 %v1272_v38  ;;  %1047 = vmatpush.bf16.msra.mxu1 %v1368_v39 }
 0x1af   : > { %1060 = vmatpush.bf16.msra.mxu2 %v1276_v42  ;;  %1073 = vmatpush.bf16.msra.mxu3 %v1372_v41 }
 0x1b1   : > { %1035 = vmatmul.bf16.vlgmr.msra.gmra.mxu0 %v876_v45  ;;  %1377 = vmatmul.msk.bf16.vlgmr.msra.gmra.mxu1 %vm1023_vm3, %v877_v48 }
 0x1b2   : > { %1079 = vmatpush.bf16.msrb.mxu1 %v1364_v46  ;;  %1378 = vmatmul.msk.bf16.vlgmr.msra.gmra.mxu3 %vm1023_vm3, %v877_v48 }
 0x1b3   : > { %1099 = vmatpush.bf16.msrb.mxu3 %v1376_v47  ;;  %1061 = vmatmul.bf16.vlgmr.msra.gmra.mxu2 %v876_v45 }
 0x1b6   : > { %1080 = vmatpush.bf16.msrb.mxu1 %v1352_v50 }
 0x1ba   : > { %1081 = vmatpush.bf16.msrb.mxu1 %v1340_v54 }
 0x1be   : > { %1082 = vmatpush.bf16.msrb.mxu1 %v1328_v56 }
 0x1c2   : > { %1083 = vmatpush.bf16.msrb.mxu1 %v1316_v59  ;;  %1379 = vmatmul.msk.bf16.vlgmr.msrb.gmra.mxu3 %vm1023_vm3, %v877_v48 }
 0x1c6   : > { %1084 = vmatpush.bf16.msrb.mxu1 %v1304_v62 }
 0x1ca   : > { %1085 = vmatpush.bf16.msrb.mxu1 %v1292_v1 }
 0x1ce   : > { %1086 = vmatpush.bf16.msrb.mxu1 %v1280_v4 }
 0x1d1   : > { %1087 = vmatmul.bf16.vlgmr.msrb.gmra.mxu1 %v876_v45 }
 0x1f7   : > { %v871_v5 = vpop.permute.xlu1 %870 }
 0x201   : > { %v1113_v32 = vpop.permute.xlu2 %1112 }
 0x22e   : > { %v1036_v6 = vpop.f32.mrf.mxu0  ;;  %v1049_v7 = vpop.f32.mrf.mxu1 }
 0x22f   : > { %v1037_v8 = vadd.f32 %v1036_v6, %v871_v5 }
 0x231   : > { %v1050_v9 = vadd.f32 %v1049_v7, %v1037_v8 }
 0x233   : > { %v1105_v10 = vmax.f32 %v1050_v9, 0.0 }
 0x235   : > { %v1075_v14 = vpop.f32.mrf.mxu3  ;;  %1134 = vmatpush.msra.mxu3 %v1105_v10 }
 0x236   : > { %v1062_v15 = vpop.f32.mrf.mxu2  ;;  %v1038_v16 = vpop.f32.mrf.mxu0  ;;  %1380 = vmatmul.msk.f32.vlgmr.msra.gmra.mxu3 %vm1115_vm5, %v1108_v12 }
 0x237   : > { %v1063_v18 = vadd.f32 %v1062_v15, %v871_v5  ;;  %v1051_v19 = vpop.f32.mrf.mxu1 }
 0x239   : > { %v1076_v20 = vadd.f32 %v1075_v14, %v1063_v18 }
 0x23b   : > { %v1106_v21 = vmax.f32 %v1076_v20, 0.0 }
 0x23d   : > { %1154 = vmatpush.msrb.mxu3 %v1106_v21  ;;  %v1077_v22 = vpop.f32.mrf.mxu3 }
 0x23e   : > { %v1064_v23 = vpop.f32.mrf.mxu2  ;;  %1381 = vmatmul.msk.f32.vlgmr.msrb.gmra.mxu3 %vm1115_vm5, %v1108_v12 }
 0x245   : > { %v1101_v24 = vpop.f32.mrf.mxu3 }
 0x24d   : > { %v1103_v27 = vpop.f32.mrf.mxu3 }
 0x24e   : > { %v1088_v25 = vpop.f32.mrf.mxu1 }
 0x24f   : > { %v1089_v26 = vadd.f32 %v1088_v25, %v871_v5 }
 0x251   : > { %v1102_v28 = vadd.f32 %v1101_v24, %v1089_v26 }
 0x253   : > { %v1107_v29 = vmax.f32 %v1102_v28, 0.0 }
 0x255   : > { %1174 = vmatpush.msrb.mxu0 %v1107_v29 }
 0x256   : > { %v1090_v30 = vpop.f32.mrf.mxu1  ;;  %1382 = vmatmul.msk.f32.vlgmr.msrb.gmra.mxu0 %vm1115_vm5, %v1108_v12 }
 0x2b9   : > { %v1136_v31 = vpop.f32.mrf.mxu3 }
 0x2ba   : > { %v1137_v34 = vadd.f32 %v1136_v31, %v1113_v32 }
 0x2c1   : > { %v1156_v33 = vpop.f32.mrf.mxu3 }
 0x2c2   : > { %v1157_v35 = vadd.f32 %v1156_v33, %v1113_v32 }
 0x2c4   : > { %v1181_v36 = vrot.slane %v1157_v35, 4 }
 0x2c6   : > { %v1183_v37 = vsel %vm569_vm1, %v1137_v34, %v1181_v36 }
 0x2c7   : > { %1185 = vst [vmem:[%s217_s12] sm:$0xff] %v1183_v37 }
 0x2d3   : > { %v1176_v11 = vpop.f32.mrf.mxu0 }
 0x2d4   : > { %v1177_v38 = vadd.f32 %v1176_v11, %v1113_v32 }
 0x2d6   : > { %1186 = vst [vmem:[%s217_s12 + $0x8] sm:$0xf] %v1177_v38 }
 0x2d7   : > { %1510 = shalt.err (!%p1507_p3)
}
 0x2d8   : > { %1416 = dma.vmem_to_hbm [thread:$0]  (%p1640_p5), %s1202_s17, 192, %s1204_s23, %s1188_s25  }
 0x2d9 PF: > { %p1422_p4 = scmp.ge.s32.totalorder %s1545_s21, 2  ;;  %s1215_s10 = sand.u32 1, %s1533_s18  }
 0x2da   : > { %s1216_s11 = scalar_lea.sflag [#allocation6], %s1215_s10 }
 0x2db   : > { %p1419_p7 = pnand %p1422_p4, %p1644_p6 }
 0x2dd   : > { %p1420_p8 = pneg %p1419_p7 }
 0x2df   : > { %1528 = dma.done.wait (%p1420_p8), %s1216_s11, 192  }
 0x2e0   : > { %1530 = vsyncadd (%p1420_p8), %s1216_s11, 4294967104  ;;  %p15_p9 = scmp.ge.s32.totalorder %s1627_s24, 4   ;;  %s1912_s18 = smov %s1537_s19 }
 0x2e1   : > { %s1913_s19 = smov %s1541_s20  ;;  %s1914_s20 = smov %s1638_s27 }
 0x2e2   : > { %s1915_s21 = smov %s1627_s24  ;;  %17 = sbr.rel (!%p15_p9) target bundleno = 3 (0x3), region = 75 }
 0x2e7   :  { %1222 = vsyncpa [#allocation6], 1 }
 0x2e8   :  { %1224 = vsyncpa [#allocation6 + $0x1], 1 }

</bundles_post_ra>
